<compile_context>
chip_gen: v7x
topology: tpu7x:2x2x1
jax: 0.10.0
libtpu: 0.0.40
codegen_flags: <defaults>
</compile_context>

<pallas_src>
import functools

import jax
import jax.numpy as jnp
from jax.experimental import pallas as pl
from jax.experimental.pallas import tpu as pltpu


_VMEM_LIMIT = 48 * 1024 * 1024  # < 64 MiB physical on v7x, above v5e/v6e defaults


# ----------------------------------------------------------------------------
# Kernels
# ----------------------------------------------------------------------------
def conv1_bn_relu_kernel(x_ref, w_ref, s_ref, b_ref, o_ref, xpad_ref):
    """3x3 conv (stride 1, pad 1) + BN affine + ReLU for one batch element.

    x_ref: (1, H, W, Cin) bf16; w_ref: (9, Cin, Cout) f32 (taps kh*3+kw);
    xpad_ref: (H+2, W+9, Cin) f32 VMEM scratch -- data at rows [1,H+1),
    cols [8,8+W) so the interior store stays sublane-aligned.
    """
    _, H, W, Cin = x_ref.shape
    Cout = w_ref.shape[2]

    xpad_ref[...] = jnp.zeros_like(xpad_ref)
    xpad_ref[pl.ds(1, H), pl.ds(8, W), :] = x_ref[0].astype(jnp.float32)

    # 9 accumulating MXU dots (no materialized im2col in HBM).
    acc = jnp.zeros((H * W, Cout), jnp.float32)
    for kh in range(3):
        for kw in range(3):
            tap = xpad_ref[pl.ds(kh, H), pl.ds(kw + 7, W), :]        # (H, W, Cin)
            acc = acc + jnp.dot(tap.reshape(H * W, Cin), w_ref[kh * 3 + kw],
                                preferred_element_type=jnp.float32)
    y = jnp.maximum(acc * s_ref[0] + b_ref[0], 0.0)
    o_ref[0] = y.reshape(H, W, Cout).astype(o_ref.dtype)


def dw_pw_block_kernel(x_ref, dw_ref, s1_ref, b1_ref, pw_ref, s2_ref, b2_ref,
                       o_ref, xpad_ref, *, stride, pool):
    """Fused MobileNet block for one batch element.

    Depthwise 3x3 (stride folded into strided VMEM tap reads) + BN1 + ReLU in
    f32 on the VPU, then pointwise 1x1 as a bf16 MXU matmul + BN2 + ReLU.
    If `pool`, the global average pool is fused into the epilogue.
    """
    _, H, W, Cin = x_ref.shape
    Cout = pw_ref.shape[1]
    Ho, Wo = H // stride, W // stride

    # Zero padding in VMEM (no HBM jnp.pad round trip).  Data lives at rows
    # [1, H+1) and columns [8, 8+W) so the interior store is sublane-aligned.
    xpad_ref[...] = jnp.zeros_like(xpad_ref)
    xpad_ref[pl.ds(1, H), pl.ds(8, W), :] = x_ref[0].astype(jnp.float32)

    def tap(kh, kw):
        # output (i, j) <- image (stride*i + kh - 1, stride*j + kw - 1)
        #               =  buffer (stride*i + kh,     stride*j + kw + 7)
        if stride == 1:
            return xpad_ref[pl.ds(kh, Ho), pl.ds(kw + 7, Wo), :]
        return xpad_ref[pl.ds(kh, Ho, stride=stride),
                        pl.ds(kw + 7, Wo, stride=stride), :]

    # Depthwise 3x3 + BN1 + ReLU (f32 on the VPU).
    acc = jnp.zeros((Ho, Wo, Cin), jnp.float32)
    for kh in range(3):
        for kw in range(3):
            acc = acc + tap(kh, kw) * dw_ref[kh * 3 + kw, :]
    y1 = jnp.maximum(acc * s1_ref[0] + b1_ref[0], 0.0)                # (Ho, Wo, Cin)

    pw = pw_ref[...]                                                  # (Cin, Cout) bf16
    s2 = s2_ref[0]
    b2 = b2_ref[0]

    if Wo % 8 == 0:
        # Layout-trivial flatten (Wo multiple of the 8-sublane tile):
        # one big MXU matmul over all Ho*Wo pixels.
        p = jnp.dot(y1.reshape(Ho * Wo, Cin).astype(pw.dtype), pw,
                    preferred_element_type=jnp.float32)
        y2 = jnp.maximum(p * s2 + b2, 0.0)                            # (Ho*Wo, Cout)
        if pool:
            o_ref[0] = jnp.mean(y2, axis=0, keepdims=True).astype(o_ref.dtype)
        else:
            o_ref[0] = y2.reshape(Ho, Wo, Cout).astype(o_ref.dtype)
    else:
        # Small / unaligned spatial tail: per-output-row MXU matmuls (no reshape).
        tot = jnp.zeros((1, Cout), jnp.float32) if pool else None
        for i in range(Ho):
            p = jnp.dot(y1[i].astype(pw.dtype), pw,
                        preferred_element_type=jnp.float32)           # (Wo, Cout)
            y2 = jnp.maximum(p * s2 + b2, 0.0)
            if pool:
                tot = tot + jnp.sum(y2, axis=0, keepdims=True)
            else:
                o_ref[0, i] = y2.astype(o_ref.dtype)
        if pool:
            o_ref[0] = (tot * (1.0 / (Ho * Wo))).astype(o_ref.dtype)


def linear_kernel(x_ref, w_ref, b_ref, o_ref):
    """Lane-dense FC: out = x @ w + b (output columns padded to 128)."""
    acc = jnp.dot(x_ref[...], w_ref[...], preferred_element_type=jnp.float32)
    o_ref[...] = (acc + b_ref[...]).astype(o_ref.dtype)


# ----------------------------------------------------------------------------
# Pallas wrappers
# ----------------------------------------------------------------------------
def conv1_bn_relu(x, w, scale, bias):
    N, H, W, Cin = x.shape
    Cout = w.shape[2]
    assert W % 8 == 0, "conv1 expects image width to be a multiple of 8"
    return pl.pallas_call(
        conv1_bn_relu_kernel,
        out_shape=jax.ShapeDtypeStruct((N, H, W, Cout), x.dtype),
        grid_spec=pltpu.PrefetchScalarGridSpec(
            num_scalar_prefetch=0,
            grid=(N,),
            in_specs=[
                pl.BlockSpec((1, H, W, Cin), lambda n: (n, 0, 0, 0)),
                pl.BlockSpec((9, Cin, Cout), lambda n: (0, 0, 0)),
                pl.BlockSpec((1, Cout), lambda n: (0, 0)),
                pl.BlockSpec((1, Cout), lambda n: (0, 0)),
            ],
            out_specs=pl.BlockSpec((1, H, W, Cout), lambda n: (n, 0, 0, 0)),
            scratch_shapes=[pltpu.VMEM((H + 2, W + 9, Cin), jnp.float32)],
        ),
        compiler_params=pltpu.CompilerParams(
            dimension_semantics=("parallel",), vmem_limit_bytes=_VMEM_LIMIT),
    )(x, w, scale.reshape(1, Cout), bias.reshape(1, Cout))


def mobilenet_block(x, blk, *, pool=False):
    N, H, W, Cin = x.shape
    stride = blk['stride']
    Cout = blk['pw_w'].shape[1]
    Ho, Wo = H // stride, W // stride

    if pool:
        out_shape = jax.ShapeDtypeStruct((N, 1, Cout), x.dtype)
        out_spec = pl.BlockSpec((1, 1, Cout), lambda n: (n, 0, 0))
    else:
        out_shape = jax.ShapeDtypeStruct((N, Ho, Wo, Cout), x.dtype)
        out_spec = pl.BlockSpec((1, Ho, Wo, Cout), lambda n: (n, 0, 0, 0))

    kern = functools.partial(dw_pw_block_kernel, stride=stride, pool=pool)
    return pl.pallas_call(
        kern,
        out_shape=out_shape,
        grid_spec=pltpu.PrefetchScalarGridSpec(
            num_scalar_prefetch=0,
            grid=(N,),
            in_specs=[
                pl.BlockSpec((1, H, W, Cin), lambda n: (n, 0, 0, 0)),
                pl.BlockSpec((9, Cin), lambda n: (0, 0)),
                pl.BlockSpec((1, Cin), lambda n: (0, 0)),
                pl.BlockSpec((1, Cin), lambda n: (0, 0)),
                pl.BlockSpec((Cin, Cout), lambda n: (0, 0)),
                pl.BlockSpec((1, Cout), lambda n: (0, 0)),
                pl.BlockSpec((1, Cout), lambda n: (0, 0)),
            ],
            out_specs=out_spec,
            scratch_shapes=[pltpu.VMEM((H + 2, W + 9, Cin), jnp.float32)],
        ),
        compiler_params=pltpu.CompilerParams(
            dimension_semantics=("parallel",), vmem_limit_bytes=_VMEM_LIMIT),
    )(x, blk['dw_w'], blk['bn1_s'].reshape(1, Cin), blk['bn1_b'].reshape(1, Cin),
      blk['pw_w'], blk['bn2_s'].reshape(1, Cout), blk['bn2_b'].reshape(1, Cout))


def linear(x, w, b):
    M, K = x.shape
    N = w.shape[1]
    return pl.pallas_call(
        linear_kernel,
        out_shape=jax.ShapeDtypeStruct((M, N), jnp.float32),
        grid_spec=pltpu.PrefetchScalarGridSpec(
            num_scalar_prefetch=0,
            grid=(1,),
            in_specs=[
                pl.BlockSpec((M, K), lambda i: (0, 0)),
                pl.BlockSpec((K, N), lambda i: (0, 0)),
                pl.BlockSpec((1, N), lambda i: (0, 0)),
            ],
            out_specs=pl.BlockSpec((M, N), lambda i: (0, 0)),
        ),
        compiler_params=pltpu.CompilerParams(dimension_semantics=("arbitrary",)),
    )(x, w, b.reshape(1, N))


# ----------------------------------------------------------------------------
# Model (parameter init + forward)
# ----------------------------------------------------------------------------
CFG = [64, (128, 2), 128, (256, 2), 256, (512, 2), 512, 512, 512, 512, 512, (1024, 2), 1024]


def init_params(key, img_shape, num_classes):
    c = img_shape[0]
    keys = iter(jax.random.split(key, 256))

    def conv_init(shape, fan_in):
        return jax.random.normal(next(keys), shape, jnp.float32) * (2.0 / fan_in) ** 0.5

    def bn_init(ch, eps=1e-5):
        gamma = jax.random.uniform(next(keys), (ch,), jnp.float32, 0.5, 1.5)
        beta = jax.random.normal(next(keys), (ch,), jnp.float32) * 0.1
        mean = jax.random.normal(next(keys), (ch,), jnp.float32) * 0.1
        var = jax.random.uniform(next(keys), (ch,), jnp.float32, 0.5, 1.5)
        s = gamma / jnp.sqrt(var + eps)
        return s, beta - mean * s

    params = {'conv1_w': conv_init((3, 3, c, 32), 9 * c).reshape(9, c, 32)}
    params['bn1_s'], params['bn1_b'] = bn_init(32)

    blocks = []
    in_planes = 32
    for entry in CFG:
        out_planes = entry if isinstance(entry, int) else entry[0]
        stride = 1 if isinstance(entry, int) else entry[1]
        blk = {
            'stride': stride,
            'dw_w': conv_init((3, 3, in_planes), 9).reshape(9, in_planes),
            'pw_w': conv_init((in_planes, out_planes), in_planes).astype(jnp.bfloat16),
        }
        blk['bn1_s'], blk['bn1_b'] = bn_init(in_planes)
        blk['bn2_s'], blk['bn2_b'] = bn_init(out_planes)
        blocks.append(blk)
        in_planes = out_planes
    params['blocks'] = blocks

    # FC padded to a lane-dense 128-wide output tile (sliced back after the call).
    ncp = max(128, ((num_classes + 127) // 128) * 128)
    fc_w = jax.random.normal(next(keys), (1024, num_classes), jnp.float32) * (1.0 / 1024) ** 0.5
    fc_b = jax.random.normal(next(keys), (num_classes,), jnp.float32) * 0.01
    params['fc_w'] = jnp.pad(fc_w, ((0, 0), (0, ncp - num_classes))).astype(jnp.bfloat16)
    params['fc_b'] = jnp.pad(fc_b, (0, ncp - num_classes))
    params['num_classes'] = num_classes
    return params


def mobilenet_forward(params, x_nchw):
    # NCHW -> NHWC, bf16 activations (MXU operands); all accumulation stays f32.
    x = jnp.transpose(x_nchw, (0, 2, 3, 1)).astype(jnp.bfloat16)
    out = conv1_bn_relu(x, params['conv1_w'], params['bn1_s'], params['bn1_b'])
    blocks = params['blocks']
    for idx, blk in enumerate(blocks):
        out = mobilenet_block(out, blk, pool=(idx == len(blocks) - 1))
    pooled = out.reshape(out.shape[0], -1)                    # (N, 1024), pool fused above
    logits = linear(pooled, params['fc_w'], params['fc_b'])   # (N, 128) f32
    return logits[:, :params['num_classes']]


if __name__ == "__main__":
    key = jax.random.PRNGKey(0)
    img_shape = (3, 16, 16)     # small spatial; channel schedule follows MobileNet cfg
    num_classes = 10
    batch = 2

    pkey, xkey = jax.random.split(key)
    params = init_params(pkey, img_shape, num_classes)
    x = jax.random.normal(xkey, (batch,) + img_shape, jnp.float32)   # NCHW, like PyTorch

    out = mobilenet_forward(params, x)
    jax.block_until_ready(out)
    assert out.shape == (batch, num_classes), out.shape
    assert jnp.all(jnp.isfinite(out.astype(jnp.float32)))
    print("KERNEL_OK")
</pallas_src>

<mosaic_0001>
module attributes {stable_mosaic.version = 11 : i64} {
  func.func @conv1_bn_relu_kernel(%arg0: i32, %arg1: memref<1x16x16x3xbf16, #tpu.memory_space<vmem>>, %arg2: memref<9x3x32xf32, #tpu.memory_space<vmem>>, %arg3: memref<1x32xf32, #tpu.memory_space<vmem>>, %arg4: memref<1x32xf32, #tpu.memory_space<vmem>>, %arg5: memref<1x16x16x32xbf16, #tpu.memory_space<vmem>>, %arg6: memref<18x25x3xf32, #tpu.memory_space<vmem>>) attributes {dimension_semantics = [#tpu.dimension_semantics<parallel>], iteration_bounds = array<i64: 2>, scalar_prefetch = 0 : i64, scratch_operands = 1 : i64, tpu.core_type = #tpu.core_type<tc>, window_params = [{transform_indices = @transform_0, window_bounds = array<i64: 1, 16, 16, 3>}, {pipeline_mode = #tpu.pipeline_mode<synchronous>, transform_indices = @transform_1, window_bounds = array<i64: 9, 3, 32>}, {pipeline_mode = #tpu.pipeline_mode<synchronous>, transform_indices = @transform_2, window_bounds = array<i64: 1, 32>}, {pipeline_mode = #tpu.pipeline_mode<synchronous>, transform_indices = @transform_3, window_bounds = array<i64: 1, 32>}, {transform_indices = @transform_4, window_bounds = array<i64: 1, 16, 16, 32>}]} {
    %cst = arith.constant 0.000000e+00 : f32
    %0 = vector.broadcast %cst : f32 to vector<18x25x3xf32>
    %c0 = arith.constant 0 : index
    %c0_0 = arith.constant 0 : index
    %c0_1 = arith.constant 0 : index
    %1 = vector.load %arg6[%c0, %c0_0, %c0_1] : memref<18x25x3xf32, #tpu.memory_space<vmem>>, vector<18x25x3xf32>
    tpu.vector_store %arg6[%c0, %c0_0, %c0_1], %0 {strides = array<i32>} : memref<18x25x3xf32, #tpu.memory_space<vmem>>, vector<18x25x3xf32>,
    %c0_2 = arith.constant 0 : index
    %c0_3 = arith.constant 0 : index
    %c0_4 = arith.constant 0 : index
    %c0_5 = arith.constant 0 : index
    %2 = vector.load %arg1[%c0_2, %c0_3, %c0_4, %c0_5] : memref<1x16x16x3xbf16, #tpu.memory_space<vmem>>, vector<1x16x16x3xbf16>
    %3 = vector.shape_cast %2 : vector<1x16x16x3xbf16> to vector<16x16x3xbf16>
    %4 = arith.extf %3 : vector<16x16x3xbf16> to vector<16x16x3xf32>
    %c1 = arith.constant 1 : index
    %c8 = arith.constant 8 : index
    %c0_6 = arith.constant 0 : index
    %5 = vector.load %arg6[%c1, %c8, %c0_6] : memref<18x25x3xf32, #tpu.memory_space<vmem>>, vector<16x16x3xf32>
    tpu.vector_store %arg6[%c1, %c8, %c0_6], %4 {strides = array<i32>} : memref<18x25x3xf32, #tpu.memory_space<vmem>>, vector<16x16x3xf32>,
    %cst_7 = arith.constant 0.000000e+00 : f32
    %6 = vector.broadcast %cst_7 : f32 to vector<256x32xf32>
    %c0_8 = arith.constant 0 : index
    %c7 = arith.constant 7 : index
    %c0_9 = arith.constant 0 : index
    %7 = vector.load %arg6[%c0_8, %c7, %c0_9] : memref<18x25x3xf32, #tpu.memory_space<vmem>>, vector<16x16x3xf32>
    %8 = vector.shape_cast %7 : vector<16x16x3xf32> to vector<256x3xf32>
    %c0_10 = arith.constant 0 : index
    %c0_11 = arith.constant 0 : index
    %c0_12 = arith.constant 0 : index
    %9 = vector.load %arg2[%c0_10, %c0_11, %c0_12] : memref<9x3x32xf32, #tpu.memory_space<vmem>>, vector<1x3x32xf32>
    %10 = vector.shape_cast %9 : vector<1x3x32xf32> to vector<3x32xf32>
    %cst_13 = arith.constant dense<0.000000e+00> : vector<256x32xf32>
    %11 = tpu.matmul %8, %10, %cst_13 {dimension_numbers = #tpu.dot_dimension_numbers<[1], [0], [0], [1], [0, 0, 1, 1], [], []>} : vector<256x3xf32>, vector<3x32xf32>, vector<256x32xf32> -> vector<256x32xf32>
    %12 = arith.addf %6, %11 : vector<256x32xf32>
    %c0_14 = arith.constant 0 : index
    %c8_15 = arith.constant 8 : index
    %c0_16 = arith.constant 0 : index
    %13 = vector.load %arg6[%c0_14, %c8_15, %c0_16] : memref<18x25x3xf32, #tpu.memory_space<vmem>>, vector<16x16x3xf32>
    %14 = vector.shape_cast %13 : vector<16x16x3xf32> to vector<256x3xf32>
    %c1_17 = arith.constant 1 : index
    %c0_18 = arith.constant 0 : index
    %c0_19 = arith.constant 0 : index
    %15 = vector.load %arg2[%c1_17, %c0_18, %c0_19] : memref<9x3x32xf32, #tpu.memory_space<vmem>>, vector<1x3x32xf32>
    %16 = vector.shape_cast %15 : vector<1x3x32xf32> to vector<3x32xf32>
    %cst_20 = arith.constant dense<0.000000e+00> : vector<256x32xf32>
    %17 = tpu.matmul %14, %16, %cst_20 {dimension_numbers = #tpu.dot_dimension_numbers<[1], [0], [0], [1], [0, 0, 1, 1], [], []>} : vector<256x3xf32>, vector<3x32xf32>, vector<256x32xf32> -> vector<256x32xf32>
    %18 = arith.addf %12, %17 : vector<256x32xf32>
    %c0_21 = arith.constant 0 : index
    %c9 = arith.constant 9 : index
    %c0_22 = arith.constant 0 : index
    %19 = vector.load %arg6[%c0_21, %c9, %c0_22] : memref<18x25x3xf32, #tpu.memory_space<vmem>>, vector<16x16x3xf32>
    %20 = vector.shape_cast %19 : vector<16x16x3xf32> to vector<256x3xf32>
    %c2 = arith.constant 2 : index
    %c0_23 = arith.constant 0 : index
    %c0_24 = arith.constant 0 : index
    %21 = vector.load %arg2[%c2, %c0_23, %c0_24] : memref<9x3x32xf32, #tpu.memory_space<vmem>>, vector<1x3x32xf32>
    %22 = vector.shape_cast %21 : vector<1x3x32xf32> to vector<3x32xf32>
    %cst_25 = arith.constant dense<0.000000e+00> : vector<256x32xf32>
    %23 = tpu.matmul %20, %22, %cst_25 {dimension_numbers = #tpu.dot_dimension_numbers<[1], [0], [0], [1], [0, 0, 1, 1], [], []>} : vector<256x3xf32>, vector<3x32xf32>, vector<256x32xf32> -> vector<256x32xf32>
    %24 = arith.addf %18, %23 : vector<256x32xf32>
    %c1_26 = arith.constant 1 : index
    %c7_27 = arith.constant 7 : index
    %c0_28 = arith.constant 0 : index
    %25 = vector.load %arg6[%c1_26, %c7_27, %c0_28] : memref<18x25x3xf32, #tpu.memory_space<vmem>>, vector<16x16x3xf32>
    %26 = vector.shape_cast %25 : vector<16x16x3xf32> to vector<256x3xf32>
    %c3 = arith.constant 3 : index
    %c0_29 = arith.constant 0 : index
    %c0_30 = arith.constant 0 : index
    %27 = vector.load %arg2[%c3, %c0_29, %c0_30] : memref<9x3x32xf32, #tpu.memory_space<vmem>>, vector<1x3x32xf32>
    %28 = vector.shape_cast %27 : vector<1x3x32xf32> to vector<3x32xf32>
    %cst_31 = arith.constant dense<0.000000e+00> : vector<256x32xf32>
    %29 = tpu.matmul %26, %28, %cst_31 {dimension_numbers = #tpu.dot_dimension_numbers<[1], [0], [0], [1], [0, 0, 1, 1], [], []>} : vector<256x3xf32>, vector<3x32xf32>, vector<256x32xf32> -> vector<256x32xf32>
    %30 = arith.addf %24, %29 : vector<256x32xf32>
    %c1_32 = arith.constant 1 : index
    %c8_33 = arith.constant 8 : index
    %c0_34 = arith.constant 0 : index
    %31 = vector.load %arg6[%c1_32, %c8_33, %c0_34] : memref<18x25x3xf32, #tpu.memory_space<vmem>>, vector<16x16x3xf32>
    %32 = vector.shape_cast %31 : vector<16x16x3xf32> to vector<256x3xf32>
    %c4 = arith.constant 4 : index
    %c0_35 = arith.constant 0 : index
    %c0_36 = arith.constant 0 : index
    %33 = vector.load %arg2[%c4, %c0_35, %c0_36] : memref<9x3x32xf32, #tpu.memory_space<vmem>>, vector<1x3x32xf32>
    %34 = vector.shape_cast %33 : vector<1x3x32xf32> to vector<3x32xf32>
    %cst_37 = arith.constant dense<0.000000e+00> : vector<256x32xf32>
    %35 = tpu.matmul %32, %34, %cst_37 {dimension_numbers = #tpu.dot_dimension_numbers<[1], [0], [0], [1], [0, 0, 1, 1], [], []>} : vector<256x3xf32>, vector<3x32xf32>, vector<256x32xf32> -> vector<256x32xf32>
    %36 = arith.addf %30, %35 : vector<256x32xf32>
    %c1_38 = arith.constant 1 : index
    %c9_39 = arith.constant 9 : index
    %c0_40 = arith.constant 0 : index
    %37 = vector.load %arg6[%c1_38, %c9_39, %c0_40] : memref<18x25x3xf32, #tpu.memory_space<vmem>>, vector<16x16x3xf32>
    %38 = vector.shape_cast %37 : vector<16x16x3xf32> to vector<256x3xf32>
    %c5 = arith.constant 5 : index
    %c0_41 = arith.constant 0 : index
    %c0_42 = arith.constant 0 : index
    %39 = vector.load %arg2[%c5, %c0_41, %c0_42] : memref<9x3x32xf32, #tpu.memory_space<vmem>>, vector<1x3x32xf32>
    %40 = vector.shape_cast %39 : vector<1x3x32xf32> to vector<3x32xf32>
    %cst_43 = arith.constant dense<0.000000e+00> : vector<256x32xf32>
    %41 = tpu.matmul %38, %40, %cst_43 {dimension_numbers = #tpu.dot_dimension_numbers<[1], [0], [0], [1], [0, 0, 1, 1], [], []>} : vector<256x3xf32>, vector<3x32xf32>, vector<256x32xf32> -> vector<256x32xf32>
    %42 = arith.addf %36, %41 : vector<256x32xf32>
    %c2_44 = arith.constant 2 : index
    %c7_45 = arith.constant 7 : index
    %c0_46 = arith.constant 0 : index
    %43 = vector.load %arg6[%c2_44, %c7_45, %c0_46] : memref<18x25x3xf32, #tpu.memory_space<vmem>>, vector<16x16x3xf32>
    %44 = vector.shape_cast %43 : vector<16x16x3xf32> to vector<256x3xf32>
    %c6 = arith.constant 6 : index
    %c0_47 = arith.constant 0 : index
    %c0_48 = arith.constant 0 : index
    %45 = vector.load %arg2[%c6, %c0_47, %c0_48] : memref<9x3x32xf32, #tpu.memory_space<vmem>>, vector<1x3x32xf32>
    %46 = vector.shape_cast %45 : vector<1x3x32xf32> to vector<3x32xf32>
    %cst_49 = arith.constant dense<0.000000e+00> : vector<256x32xf32>
    %47 = tpu.matmul %44, %46, %cst_49 {dimension_numbers = #tpu.dot_dimension_numbers<[1], [0], [0], [1], [0, 0, 1, 1], [], []>} : vector<256x3xf32>, vector<3x32xf32>, vector<256x32xf32> -> vector<256x32xf32>
    %48 = arith.addf %42, %47 : vector<256x32xf32>
    %c2_50 = arith.constant 2 : index
    %c8_51 = arith.constant 8 : index
    %c0_52 = arith.constant 0 : index
    %49 = vector.load %arg6[%c2_50, %c8_51, %c0_52] : memref<18x25x3xf32, #tpu.memory_space<vmem>>, vector<16x16x3xf32>
    %50 = vector.shape_cast %49 : vector<16x16x3xf32> to vector<256x3xf32>
    %c7_53 = arith.constant 7 : index
    %c0_54 = arith.constant 0 : index
    %c0_55 = arith.constant 0 : index
    %51 = vector.load %arg2[%c7_53, %c0_54, %c0_55] : memref<9x3x32xf32, #tpu.memory_space<vmem>>, vector<1x3x32xf32>
    %52 = vector.shape_cast %51 : vector<1x3x32xf32> to vector<3x32xf32>
    %cst_56 = arith.constant dense<0.000000e+00> : vector<256x32xf32>
    %53 = tpu.matmul %50, %52, %cst_56 {dimension_numbers = #tpu.dot_dimension_numbers<[1], [0], [0], [1], [0, 0, 1, 1], [], []>} : vector<256x3xf32>, vector<3x32xf32>, vector<256x32xf32> -> vector<256x32xf32>
    %54 = arith.addf %48, %53 : vector<256x32xf32>
    %c2_57 = arith.constant 2 : index
    %c9_58 = arith.constant 9 : index
    %c0_59 = arith.constant 0 : index
    %55 = vector.load %arg6[%c2_57, %c9_58, %c0_59] : memref<18x25x3xf32, #tpu.memory_space<vmem>>, vector<16x16x3xf32>
    %56 = vector.shape_cast %55 : vector<16x16x3xf32> to vector<256x3xf32>
    %c8_60 = arith.constant 8 : index
    %c0_61 = arith.constant 0 : index
    %c0_62 = arith.constant 0 : index
    %57 = vector.load %arg2[%c8_60, %c0_61, %c0_62] : memref<9x3x32xf32, #tpu.memory_space<vmem>>, vector<1x3x32xf32>
    %58 = vector.shape_cast %57 : vector<1x3x32xf32> to vector<3x32xf32>
    %cst_63 = arith.constant dense<0.000000e+00> : vector<256x32xf32>
    %59 = tpu.matmul %56, %58, %cst_63 {dimension_numbers = #tpu.dot_dimension_numbers<[1], [0], [0], [1], [0, 0, 1, 1], [], []>} : vector<256x3xf32>, vector<3x32xf32>, vector<256x32xf32> -> vector<256x32xf32>
    %60 = arith.addf %54, %59 : vector<256x32xf32>
    %c0_64 = arith.constant 0 : index
    %c0_65 = arith.constant 0 : index
    %61 = vector.load %arg3[%c0_64, %c0_65] : memref<1x32xf32, #tpu.memory_space<vmem>>, vector<1x32xf32>
    %62 = vector.shape_cast %61 : vector<1x32xf32> to vector<32xf32>
    %63 = vector.shape_cast %62 : vector<32xf32> to vector<1x32xf32>
    %64 = vector.broadcast %63 : vector<1x32xf32> to vector<256x32xf32>
    %65 = arith.mulf %60, %64 : vector<256x32xf32>
    %c0_66 = arith.constant 0 : index
    %c0_67 = arith.constant 0 : index
    %66 = vector.load %arg4[%c0_66, %c0_67] : memref<1x32xf32, #tpu.memory_space<vmem>>, vector<1x32xf32>
    %67 = vector.shape_cast %66 : vector<1x32xf32> to vector<32xf32>
    %68 = vector.shape_cast %67 : vector<32xf32> to vector<1x32xf32>
    %69 = vector.broadcast %68 : vector<1x32xf32> to vector<256x32xf32>
    %70 = arith.addf %65, %69 : vector<256x32xf32>
    %cst_68 = arith.constant 0.000000e+00 : f32
    %71 = vector.broadcast %cst_68 : f32 to vector<256x32xf32>
    %72 = arith.maximumf %70, %71 : vector<256x32xf32>
    %73 = vector.shape_cast %72 : vector<256x32xf32> to vector<16x16x32xf32>
    %74 = arith.truncf %73 : vector<16x16x32xf32> to vector<16x16x32xbf16>
    %c0_69 = arith.constant 0 : index
    %c0_70 = arith.constant 0 : index
    %c0_71 = arith.constant 0 : index
    %c0_72 = arith.constant 0 : index
    %75 = vector.load %arg5[%c0_69, %c0_70, %c0_71, %c0_72] : memref<1x16x16x32xbf16, #tpu.memory_space<vmem>>, vector<1x16x16x32xbf16>
    %76 = vector.shape_cast %75 : vector<1x16x16x32xbf16> to vector<16x16x32xbf16>
    %77 = vector.shape_cast %74 : vector<16x16x32xbf16> to vector<1x16x16x32xbf16>
    tpu.vector_store %arg5[%c0_69, %c0_70, %c0_71, %c0_72], %77 {strides = array<i32>} : memref<1x16x16x32xbf16, #tpu.memory_space<vmem>>, vector<1x16x16x32xbf16>,
    return
  }
  func.func @transform_0(%arg0: i32) -> (i32, i32, i32, i32) {
    %c0_i32 = arith.constant 0 : i32
    %c0_i32_0 = arith.constant 0 : i32
    %c0_i32_1 = arith.constant 0 : i32
    %c0_i32_2 = arith.constant 0 : i32
    return %arg0, %c0_i32, %c0_i32_0, %c0_i32_1 : i32, i32, i32, i32
  }
  func.func @transform_1(%arg0: i32) -> (i32, i32, i32) {
    %c0_i32 = arith.constant 0 : i32
    %c0_i32_0 = arith.constant 0 : i32
    %c0_i32_1 = arith.constant 0 : i32
    %c0_i32_2 = arith.constant 0 : i32
    return %c0_i32, %c0_i32_0, %c0_i32_1 : i32, i32, i32
  }
  func.func @transform_2(%arg0: i32) -> (i32, i32) {
    %c0_i32 = arith.constant 0 : i32
    %c0_i32_0 = arith.constant 0 : i32
    %c0_i32_1 = arith.constant 0 : i32
    return %c0_i32, %c0_i32_0 : i32, i32
  }
  func.func @transform_3(%arg0: i32) -> (i32, i32) {
    %c0_i32 = arith.constant 0 : i32
    %c0_i32_0 = arith.constant 0 : i32
    %c0_i32_1 = arith.constant 0 : i32
    return %c0_i32, %c0_i32_0 : i32, i32
  }
  func.func @transform_4(%arg0: i32) -> (i32, i32, i32, i32) {
    %c0_i32 = arith.constant 0 : i32
    %c0_i32_0 = arith.constant 0 : i32
    %c0_i32_1 = arith.constant 0 : i32
    %c0_i32_2 = arith.constant 0 : i32
    return %arg0, %c0_i32, %c0_i32_0, %c0_i32_1 : i32, i32, i32, i32
  }
}

</mosaic_0001>

<bundles_post_ra>
// kernel: tpu_custom_call.1
= control target key start
LH: loop header
LB: loop body
LE: loop exit
PB: predicated region body
PF: predicated region fallthrough
CT: control target
= control target key end

     0   :  { %9 = vsyncpa [#allocation4], 0  ;;  %s7058_s0 = inlined_call_operand.vmem [shape: bf16[2,16,16,3], index: 0, kind: input, shape index: {}]   ;;  %s7059_s1 = inlined_call_operand.vmem [shape: f32[9,3,32], index: 1, kind: input, shape index: {}]   ;;  %s7060_s2 = inlined_call_operand.vmem [shape: f32[1,32], index: 2, kind: input, shape index: {}]   ;;  %s7061_s3 = inlined_call_operand.vmem [shape: f32[1,32], index: 3, kind: input, shape index: {}]   ;;  %s7062_s4 = inlined_call_operand.hbm [shape: bf16[2,16,16,32], index: 4, kind: output, shape index: {}]  }
   0x1   :  { %11 = vsyncpa [#allocation4 + $0x1], 0  ;;  %s5765_s15 = smov 0   ;;  %s5767_s16 = smov 0  }
   0x2   :  { %s5769_s17 = smov 0   ;;  %s5771_s18 = smov 0  }
   0x3 LB: > { %s5786_s19 = sadd.s32 4294967295, %s5734_s18   ;;  %s4161_s20 = sadd.s32 4294967294, %s5734_s18   ;;  %s5734_s18 = sphi %s5771_s18, %s7175_s18   ;;  %s5730_s17 = sphi %s5769_s17, %s7174_s17   ;;  %s5726_s16 = sphi %s5767_s16, %s7173_s16   ;;  %s5722_s15 = sphi %s5765_s15, %s7172_s15  }
   0x4   : > { %s5790_s21 = sadd.s32 1, %s5734_s18   ;;  %s113_s22 = sadd.s32 1, %s5730_s17 }
   0x5   : > { %s110_s23 = ssub.s32 %s5734_s18, %s5790_s21  ;;  %p123_p0 = scmp.ne.s32.totalorder %s5730_s17, %s5726_s16 }
   0x6   : > { %p111_p1 = scmp.eq.s32.totalorder %s110_s23, 0  ;;  %p124_p2 = scmp.eq.s32.totalorder %s5786_s19, 1 }
   0x7   : > { %p129_p3 = scmp.ne.s32.totalorder %s5726_s16, %s5722_s15  ;;  %p130_p4 = scmp.eq.s32.totalorder %s4161_s20, 1 }
   0x8   : > { %s5801_s24 = scalar_select %p111_p1, %s5730_s17, %s113_s22  }
   0x9   : > { %p5803_p5 = por %p124_p2, %p123_p0  ;;  %p5807_p6 = por %p130_p4, %p129_p3 }
   0xa   : > { %p4164_p7 = scmp.ge.s32.totalorder %s5734_s18, 1  ;;  %p165_p8 = scmp.lt.s32.totalorder %s5734_s18, 3 }
   0xc   : > { %p166_p9 = pnand %p4164_p7, %p165_p8 }
   0xe   : > { %169 = sbr.rel (%p166_p9) target bundleno = 589 (0x24d), region = 36 }
  0x15   : > { %v5816_v0 = vld [vmem:[%s7059_s1 + $0x4] sm:$0x7]  ;;  %vm530_vm0 = vcmask 1042432   ;;  %vm196_vm1 = vcmask 23552   ;;  %p191_p10 = scmp.lt.s32.totalorder %s5786_s19, 1  ;;  %v5736_v1 = vmov 0.0  }
  0x16   : > { %4922 = vmatprep.subr.msk.mxu1 %vm530_vm0, %v5816_v0  ;;  %198 = vst.msk [vmem:[#allocation2 + $0x8] sm:$0xff] %vm196_vm1, %v5736_v1  ;;  %197 = vst.msk [vmem:[#allocation2] sm:$0xff] %vm196_vm1, %v5736_v1  ;;  %v5932_v2 = vld [vmem:[%s7059_s1 + $0x10] sm:$0x7]  ;;  %v5937_v3 = vld [vmem:[%s7059_s1] sm:$0x7] }
  0x17   : > { %199 = vst.msk [vmem:[#allocation2 + $0x10] sm:$0xff] %vm196_vm1, %v5736_v1  ;;  %202 = vst.msk [vmem:[#allocation2 + $0x20] sm:$0xff] %vm196_vm1, %v5736_v1  ;;  %v5942_v4 = vld [vmem:[%s7059_s1 + $0x14] sm:$0x7]  ;;  %4923 = vmatpush3.msk.msra.mxu1 %vm530_vm0, %v5816_v0  ;;  %5122 = vmatprep.subr.msk.mxu0 %vm530_vm0, %v5932_v2  ;;  %s192_s9 = scalar_select %p191_p10, %s5786_s19, 1  ;;  %vm200_vm2 = vcmask 16384  }
  0x18   : > { %203 = vst.msk [vmem:[#allocation2 + $0x28] sm:$0xff] %vm196_vm1, %v5736_v1  ;;  %204 = vst.msk [vmem:[#allocation2 + $0x30] sm:$0xff] %vm196_vm1, %v5736_v1  ;;  %5123 = vmatpush3.msk.msra.mxu0 %vm530_vm0, %v5932_v2  ;;  %4972 = vmatprep.subr.msk.mxu1 %vm530_vm0, %v5937_v3  ;;  %v6007_v15 = vld [vmem:[%s7059_s1 + $0x8] sm:$0x7]  ;;  %v4371_v59 = vld [vmem:[%s7059_s1 + $0x18] sm:$0x7] }
  0x19   : > { %206 = vst.msk [vmem:[#allocation2 + $0x40] sm:$0xff] %vm196_vm1, %v5736_v1  ;;  %207 = vst.msk [vmem:[#allocation2 + $0x48] sm:$0xff] %vm196_vm1, %v5736_v1  ;;  %s4512_s10 = sshll.u32 %s192_s9, 7  ;;  %5172 = vmatprep.subr.msk.mxu0 %vm530_vm0, %v5942_v4  ;;  %s188_s9 = sand.u32 1, %s5726_s16   ;;  %vm4052_vm3 = vcmask 257024  }
  0x1a   : > { %208 = vst.msk [vmem:[#allocation2 + $0x50] sm:$0xff] %vm196_vm1, %v5736_v1  ;;  %210 = vst.msk [vmem:[#allocation2 + $0x60] sm:$0xff] %vm196_vm1, %v5736_v1  ;;  %s5996_s13 = scalar_lea.vmem %s7058_s0, %s4512_s10  ;;  %s4165_s12 = sshll.u32 %s188_s9, 7 }
  0x1b   : > { %211 = vst.msk [vmem:[#allocation2 + $0x68] sm:$0xff] %vm196_vm1, %v5736_v1  ;;  %212 = vst.msk [vmem:[#allocation2 + $0x70] sm:$0xff] %vm196_vm1, %v5736_v1  ;;  %v4547_v5 = vld [vmem:[%s5996_s13] sm:$0xff]   ;;  %v4610_v6 = vld [vmem:[%s5996_s13 + $0x8] sm:$0xff]   ;;  %s4545_s14 = sshll.u32 %s5786_s19, 11  ;;  %s7017_s19 = scalar_lea.sflag [#allocation4], %s188_s9 }
  0x1c   : > { %214 = vst.msk [vmem:[#allocation2 + $0x80] sm:$0xff] %vm196_vm1, %v5736_v1  ;;  %215 = vst.msk [vmem:[#allocation2 + $0x88] sm:$0xff] %vm196_vm1, %v5736_v1  ;;  %v4611_v7 = vld [vmem:[%s5996_s13 + $0x10] sm:$0xff]   ;;  %v4548_v8 = vunpack.c.l.bf16 %v4547_v5  ;;  %v4549_v9 = vunpack.c.h.bf16 %v4547_v5  ;;  %v4552_v10 = vunpack.c.l.bf16 %v4610_v6  ;;  %v4553_v11 = vunpack.c.h.bf16 %v4610_v6  ;;  %v4612_v12 = vld [vmem:[%s5996_s13 + $0x18] sm:$0xff]   ;;  %s7007_s27 = scalar_lea.hbm %s7062_s4, %s4545_s14  ;;  %s5737_s29 = smov [#allocation3]  }
  0x1d   : > { %216 = vst.msk [vmem:[#allocation2 + $0x90] sm:$0xff] %vm196_vm1, %v5736_v1  ;;  %218 = vst.msk [vmem:[#allocation2 + $0xa0] sm:$0xff] %vm196_vm1, %v5736_v1  ;;  %v4613_v13 = vld [vmem:[%s5996_s13 + $0x20] sm:$0xff]   ;;  %v4614_v14 = vld [vmem:[%s5996_s13 + $0x28] sm:$0xff]   ;;  %v4556_v18 = vunpack.c.l.bf16 %v4611_v7  ;;  %v4557_v19 = vunpack.c.h.bf16 %v4611_v7  ;;  %v4560_v20 = vunpack.c.l.bf16 %v4612_v12  ;;  %v4561_v21 = vunpack.c.h.bf16 %v4612_v12  ;;  %s5676_s30 = sshll.u32 %s5737_s29, 4  ;;  %s5677_s30 = int_to_ptr.vmem [resolvable:$false] %s5676_s30 }
  0x1e   : > { %219 = vst.msk [vmem:[#allocation2 + $0xa8] sm:$0xff] %vm196_vm1, %v5736_v1  ;;  %220 = vst.msk [vmem:[#allocation2 + $0xb0] sm:$0xff] %vm196_vm1, %v5736_v1  ;;  %v400_v16 = vld [vmem:[#allocation2 + $0x8] sm:$0xff]  ;;  %v401_v17 = vld [vmem:[#allocation2 + $0x10] sm:$0xff]  ;;  %v4564_v23 = vunpack.c.l.bf16 %v4613_v13  ;;  %v4565_v24 = vunpack.c.h.bf16 %v4613_v13  ;;  %v4568_v25 = vunpack.c.l.bf16 %v4614_v14  ;;  %v4569_v26 = vunpack.c.h.bf16 %v4614_v14  ;;  %s5678_s5 = scalar_lea.vmem %s5677_s30, 4096 }
  0x1f   : > { %222 = vst.msk [vmem:[#allocation2 + $0xc0] sm:$0xff] %vm196_vm1, %v5736_v1  ;;  %223 = vst.msk [vmem:[#allocation2 + $0xc8] sm:$0xff] %vm196_vm1, %v5736_v1  ;;  %v4615_v22 = vld [vmem:[%s5996_s13 + $0x30] sm:$0xff]   ;;  %4924 = vmatprep.mubr.msk.f32.mxu1 %vm196_vm1, %v400_v16  ;;  %v4616_v27 = vld [vmem:[%s5996_s13 + $0x38] sm:$0xff]  }
  0x20   : > { %224 = vst.msk [vmem:[#allocation2 + $0xd0] sm:$0xff] %vm196_vm1, %v5736_v1  ;;  %226 = vst.msk [vmem:[#allocation2 + $0xe0] sm:$0xff] %vm196_vm1, %v5736_v1  ;;  %v4617_v28 = vld [vmem:[%s5996_s13 + $0x40] sm:$0xff]   ;;  %v4618_v29 = vld [vmem:[%s5996_s13 + $0x48] sm:$0xff]   ;;  %4925 = vmatmul.mubr.msk.f32.vlgmr.msra.gmra.mrb[0].mxu1 %vm196_vm1, %v401_v17  ;;  %v4572_v30 = vunpack.c.l.bf16 %v4615_v22  ;;  %v4573_v31 = vunpack.c.h.bf16 %v4615_v22  ;;  %v4576_v32 = vunpack.c.l.bf16 %v4616_v27  ;;  %v4577_v33 = vunpack.c.h.bf16 %v4616_v27 }
  0x21   : > { %227 = vst.msk [vmem:[#allocation2 + $0xe8] sm:$0xff] %vm196_vm1, %v5736_v1  ;;  %228 = vst.msk [vmem:[#allocation2 + $0xf0] sm:$0xff] %vm196_vm1, %v5736_v1  ;;  %v4619_v34 = vld [vmem:[%s5996_s13 + $0x50] sm:$0xff]   ;;  %v4620_v35 = vld [vmem:[%s5996_s13 + $0x58] sm:$0xff]   ;;  %4973 = vmatpush3.msk.msra.mxu1 %vm530_vm0, %v5937_v3  ;;  %v4580_v37 = vunpack.c.l.bf16 %v4617_v28  ;;  %v4581_v38 = vunpack.c.h.bf16 %v4617_v28  ;;  %v4584_v39 = vunpack.c.l.bf16 %v4618_v29  ;;  %v4585_v40 = vunpack.c.h.bf16 %v4618_v29 }
  0x22   : > { %230 = vst.msk [vmem:[#allocation2 + $0x100] sm:$0xff] %vm196_vm1, %v5736_v1  ;;  %231 = vst.msk [vmem:[#allocation2 + $0x108] sm:$0xff] %vm196_vm1, %v5736_v1  ;;  %v4621_v36 = vld [vmem:[%s5996_s13 + $0x60] sm:$0xff]   ;;  %v4622_v41 = vld [vmem:[%s5996_s13 + $0x68] sm:$0xff]   ;;  %v4588_v43 = vunpack.c.l.bf16 %v4619_v34  ;;  %v4589_v44 = vunpack.c.h.bf16 %v4619_v34  ;;  %v4592_v45 = vunpack.c.l.bf16 %v4620_v35  ;;  %v4593_v46 = vunpack.c.h.bf16 %v4620_v35  ;;  %5022 = vmatprep.subr.msk.mxu1 %vm530_vm0, %v6007_v15 }
  0x23   : > { %232 = vst.msk [vmem:[#allocation2 + $0x110] sm:$0xff] %vm196_vm1, %v5736_v1  ;;  %234 = vst.msk [vmem:[#allocation2 + $0x120] sm:$0xff] %vm196_vm1, %v5736_v1  ;;  %v4623_v42 = vld [vmem:[%s5996_s13 + $0x70] sm:$0xff]   ;;  %v4624_v47 = vld [vmem:[%s5996_s13 + $0x78] sm:$0xff]   ;;  %v4596_v48 = vunpack.c.l.bf16 %v4621_v36  ;;  %v4597_v49 = vunpack.c.h.bf16 %v4621_v36  ;;  %v4600_v50 = vunpack.c.l.bf16 %v4622_v41  ;;  %v4601_v51 = vunpack.c.h.bf16 %v4622_v41  ;;  %s6877_s13 = scalar_lea.vmem [#allocation3], %s4165_s12 }
  0x24   : > { %235 = vst.msk [vmem:[#allocation2 + $0x128] sm:$0xff] %vm196_vm1, %v5736_v1  ;;  %236 = vst.msk [vmem:[#allocation2 + $0x130] sm:$0xff] %vm196_vm1, %v5736_v1  ;;  %v4604_v52 = vunpack.c.l.bf16 %v4623_v42  ;;  %v4605_v53 = vunpack.c.h.bf16 %v4623_v42  ;;  %v4608_v54 = vunpack.c.l.bf16 %v4624_v47  ;;  %v4609_v55 = vunpack.c.h.bf16 %v4624_v47  ;;  %v6170_v17 = vld [vmem:[%s7059_s1 + $0x1c] sm:$0x7]  ;;  %v368_v42 = vld [vmem:[#allocation2 + $0xf] sm:$0xff]  ;;  %s4099_s20 = sshll.u32 %s6877_s13, 4  ;;  %s7009_s20 = int_to_ptr.vmem [resolvable:$true] %s4099_s20 }
  0x25   : > { %238 = vst.msk [vmem:[#allocation2 + $0x140] sm:$0xff] %vm196_vm1, %v5736_v1  ;;  %239 = vst.msk [vmem:[#allocation2 + $0x148] sm:$0xff] %vm196_vm1, %v5736_v1  ;;  %s5672_s28 = scalar_lea.vmem %s7009_s20, 2048  ;;  %p5679_p0 = scmp.lt.s32.totalorder %s7009_s20, %s5677_s30 }
  0x26   : > { %240 = vst.msk [vmem:[#allocation2 + $0x150] sm:$0xff] %vm196_vm1, %v5736_v1  ;;  %242 = vst.msk [vmem:[#allocation2 + $0x160] sm:$0xff] %vm196_vm1, %v5736_v1  ;;  %p5673_p11 = scmp.ne.s32.totalorder %s7009_s20, %s5672_s28  ;;  %p5680_p1 = scmp.lt.s32.totalorder %s5678_s5, %s5672_s28 }
  0x27   : > { %243 = vst.msk [vmem:[#allocation2 + $0x168] sm:$0xff] %vm196_vm1, %v5736_v1  ;;  %244 = vst.msk [vmem:[#allocation2 + $0x170] sm:$0xff] %vm196_vm1, %v5736_v1 }
  0x28   : > { %246 = vst.msk [vmem:[#allocation2 + $0x180] sm:$0xff] %vm196_vm1, %v5736_v1  ;;  %247 = vst.msk [vmem:[#allocation2 + $0x188] sm:$0xff] %vm196_vm1, %v5736_v1  ;;  %p5674_p12 = pnand %p5673_p11, %p5803_p5  ;;  %p5681_p2 = por %p5680_p1, %p5679_p0 }
  0x29   : > { %248 = vst.msk [vmem:[#allocation2 + $0x190] sm:$0xff] %vm196_vm1, %v5736_v1  ;;  %250 = vst.msk [vmem:[#allocation2 + $0x1a0] sm:$0xff] %vm196_vm1, %v5736_v1 }
  0x2a   : > { %251 = vst.msk [vmem:[#allocation2 + $0x1a8] sm:$0xff] %vm196_vm1, %v5736_v1  ;;  %252 = vst.msk [vmem:[#allocation2 + $0x1b0] sm:$0xff] %vm196_vm1, %v5736_v1  ;;  %p5675_p13 = pneg %p5674_p12 }
  0x2b   : > { %254 = vst.msk [vmem:[#allocation2 + $0x1c0] sm:$0xff] %vm196_vm1, %v5736_v1  ;;  %255 = vst.msk [vmem:[#allocation2 + $0x1c8] sm:$0xff] %vm196_vm1, %v5736_v1 }
  0x2c   : > { %256 = vst.msk [vmem:[#allocation2 + $0x1d0] sm:$0xff] %vm196_vm1, %v5736_v1  ;;  %258 = vst.msk [vmem:[#allocation2 + $0x1e0] sm:$0xff] %vm196_vm1, %v5736_v1  ;;  %p5682_p3 = pnand %p5681_p2, %p5675_p13 }
  0x2d   : > { %259 = vst.msk [vmem:[#allocation2 + $0x1e8] sm:$0xff] %vm196_vm1, %v5736_v1  ;;  %260 = vst.msk [vmem:[#allocation2 + $0x1f0] sm:$0xff] %vm196_vm1, %v5736_v1 }
  0x2e   : > { %262 = vst.msk [vmem:[#allocation2 + $0x200] sm:$0xff] %vm196_vm1, %v5736_v1  ;;  %263 = vst.msk [vmem:[#allocation2 + $0x208] sm:$0xff] %vm196_vm1, %v5736_v1 }
  0x2f   : > { %264 = vst.msk [vmem:[#allocation2 + $0x210] sm:$0xff] %vm196_vm1, %v5736_v1  ;;  %266 = vst.msk [vmem:[#allocation2 + $0x220] sm:$0xff] %vm196_vm1, %v5736_v1 }
  0x30   : > { %267 = vst.msk [vmem:[#allocation2 + $0x228] sm:$0xff] %vm196_vm1, %v5736_v1  ;;  %268 = vst.msk [vmem:[#allocation2 + $0x230] sm:$0xff] %vm196_vm1, %v5736_v1 }
  0x31   : > { %205 = vst.msk [vmem:[#allocation2 + $0x38] sm:$0x1] %vm200_vm2, %v5736_v1  ;;  %201 = vst.msk [vmem:[#allocation2 + $0x18] sm:$0x1] %vm200_vm2, %v5736_v1 }
  0x32   : > { %209 = vst.msk [vmem:[#allocation2 + $0x58] sm:$0x1] %vm200_vm2, %v5736_v1  ;;  %213 = vst.msk [vmem:[#allocation2 + $0x78] sm:$0x1] %vm200_vm2, %v5736_v1 }
  0x33   : > { %217 = vst.msk [vmem:[#allocation2 + $0x98] sm:$0x1] %vm200_vm2, %v5736_v1  ;;  %221 = vst.msk [vmem:[#allocation2 + $0xb8] sm:$0x1] %vm200_vm2, %v5736_v1 }
  0x34   : > { %225 = vst.msk [vmem:[#allocation2 + $0xd8] sm:$0x1] %vm200_vm2, %v5736_v1  ;;  %229 = vst.msk [vmem:[#allocation2 + $0xf8] sm:$0x1] %vm200_vm2, %v5736_v1 }
  0x35   : > { %233 = vst.msk [vmem:[#allocation2 + $0x118] sm:$0x1] %vm200_vm2, %v5736_v1  ;;  %237 = vst.msk [vmem:[#allocation2 + $0x138] sm:$0x1] %vm200_vm2, %v5736_v1 }
  0x36   : > { %241 = vst.msk [vmem:[#allocation2 + $0x158] sm:$0x1] %vm200_vm2, %v5736_v1  ;;  %245 = vst.msk [vmem:[#allocation2 + $0x178] sm:$0x1] %vm200_vm2, %v5736_v1 }
  0x37   : > { %249 = vst.msk [vmem:[#allocation2 + $0x198] sm:$0x1] %vm200_vm2, %v5736_v1  ;;  %253 = vst.msk [vmem:[#allocation2 + $0x1b8] sm:$0x1] %vm200_vm2, %v5736_v1 }
  0x38   : > { %257 = vst.msk [vmem:[#allocation2 + $0x1d8] sm:$0x1] %vm200_vm2, %v5736_v1  ;;  %261 = vst.msk [vmem:[#allocation2 + $0x1f8] sm:$0x1] %vm200_vm2, %v5736_v1 }
  0x39   : > { %265 = vst.msk [vmem:[#allocation2 + $0x218] sm:$0x1] %vm200_vm2, %v5736_v1  ;;  %269 = vst.msk [vmem:[#allocation2 + $0x238] sm:$0x1] %vm200_vm2, %v5736_v1 }
  0x3a   : > { %335 = vst.msk [vmem:[#allocation2 + $0x28] sm:$0xff] %vm196_vm1, %v4548_v8  ;;  %336 = vst.msk [vmem:[#allocation2 + $0x30] sm:$0xff] %vm196_vm1, %v4549_v9 }
  0x3b   : > { %337 = vst.msk [vmem:[#allocation2 + $0x48] sm:$0xff] %vm196_vm1, %v4552_v10  ;;  %338 = vst.msk [vmem:[#allocation2 + $0x50] sm:$0xff] %vm196_vm1, %v4553_v11 }
  0x3c   : > { %339 = vst.msk [vmem:[#allocation2 + $0x68] sm:$0xff] %vm196_vm1, %v4556_v18  ;;  %340 = vst.msk [vmem:[#allocation2 + $0x70] sm:$0xff] %vm196_vm1, %v4557_v19 }
  0x3d   : > { %341 = vst.msk [vmem:[#allocation2 + $0x88] sm:$0xff] %vm196_vm1, %v4560_v20  ;;  %342 = vst.msk [vmem:[#allocation2 + $0x90] sm:$0xff] %vm196_vm1, %v4561_v21 }
  0x3e   : > { %343 = vst.msk [vmem:[#allocation2 + $0xa8] sm:$0xff] %vm196_vm1, %v4564_v23  ;;  %344 = vst.msk [vmem:[#allocation2 + $0xb0] sm:$0xff] %vm196_vm1, %v4565_v24 }
  0x3f   : > { %345 = vst.msk [vmem:[#allocation2 + $0xc8] sm:$0xff] %vm196_vm1, %v4568_v25  ;;  %346 = vst.msk [vmem:[#allocation2 + $0xd0] sm:$0xff] %vm196_vm1, %v4569_v26 }
  0x40   : > { %347 = vst.msk [vmem:[#allocation2 + $0xe8] sm:$0xff] %vm196_vm1, %v4572_v30  ;;  %348 = vst.msk [vmem:[#allocation2 + $0xf0] sm:$0xff] %vm196_vm1, %v4573_v31 }
  0x41   : > { %349 = vst.msk [vmem:[#allocation2 + $0x108] sm:$0xff] %vm196_vm1, %v4576_v32  ;;  %350 = vst.msk [vmem:[#allocation2 + $0x110] sm:$0xff] %vm196_vm1, %v4577_v33  ;;  %v402_v56 = vld [vmem:[#allocation2 + $0x28] sm:$0xff]  ;;  %v403_v57 = vld [vmem:[#allocation2 + $0x30] sm:$0xff] }
  0x42   : > { %351 = vst.msk [vmem:[#allocation2 + $0x128] sm:$0xff] %vm196_vm1, %v4580_v37  ;;  %352 = vst.msk [vmem:[#allocation2 + $0x130] sm:$0xff] %vm196_vm1, %v4581_v38  ;;  %v6053_v58 = vld [vmem:[#allocation2 + $0x48] sm:$0xff]  ;;  %4927 = vmatprep.mubr.msk.f32.mxu1 %vm196_vm1, %v402_v56  ;;  %5124 = vmatprep.mubr.msk.f32.mxu0 %vm196_vm1, %v402_v56  ;;  %v6070_v60 = vld [vmem:[#allocation2 + $0x50] sm:$0xff] }
  0x43   : > { %353 = vst.msk [vmem:[#allocation2 + $0x148] sm:$0xff] %vm196_vm1, %v4584_v39  ;;  %354 = vst.msk [vmem:[#allocation2 + $0x150] sm:$0xff] %vm196_vm1, %v4585_v40  ;;  %4928 = vmatmul.mubr.msk.f32.gmra.mrb[2].mxu1 %vm196_vm1, %v403_v57  ;;  %5125 = vmatmul.mubr.msk.f32.vlgmr.msra.gmra.mrb[0].mxu0 %vm196_vm1, %v403_v57  ;;  %v6074_v61 = vld [vmem:[#allocation2 + $0x68] sm:$0xff]  ;;  %v6085_v62 = vld [vmem:[#allocation2 + $0x70] sm:$0xff] }
  0x44   : > { %355 = vst.msk [vmem:[#allocation2 + $0x168] sm:$0xff] %vm196_vm1, %v4588_v43  ;;  %356 = vst.msk [vmem:[#allocation2 + $0x170] sm:$0xff] %vm196_vm1, %v4589_v44  ;;  %5173 = vmatpush3.msk.msra.mxu0 %vm530_vm0, %v5942_v4  ;;  %4930 = vmatprep.mubr.msk.f32.mxu1 %vm196_vm1, %v6053_v58  ;;  %v6087_v63 = vld [vmem:[#allocation2 + $0x88] sm:$0xff]  ;;  %v6097_v0 = vld [vmem:[#allocation2 + $0x90] sm:$0xff] }
  0x45   : > { %357 = vst.msk [vmem:[#allocation2 + $0x188] sm:$0xff] %vm196_vm1, %v4592_v45  ;;  %358 = vst.msk [vmem:[#allocation2 + $0x190] sm:$0xff] %vm196_vm1, %v4593_v46  ;;  %5127 = vmatprep.mubr.msk.f32.mxu0 %vm196_vm1, %v6053_v58  ;;  %5222 = vmatprep.subr.msk.mxu0 %vm530_vm0, %v4371_v59  ;;  %v6099_v1 = vld [vmem:[#allocation2 + $0xa8] sm:$0xff]  ;;  %v6109_v3 = vld [vmem:[#allocation2 + $0xb0] sm:$0xff] }
  0x46   : > { %359 = vst.msk [vmem:[#allocation2 + $0x1a8] sm:$0xff] %vm196_vm1, %v4596_v48  ;;  %360 = vst.msk [vmem:[#allocation2 + $0x1b0] sm:$0xff] %vm196_vm1, %v4597_v49  ;;  %v6111_v4 = vld [vmem:[#allocation2 + $0xc8] sm:$0xff]  ;;  %v6121_v5 = vld [vmem:[#allocation2 + $0xd0] sm:$0xff] }
  0x47   : > { %361 = vst.msk [vmem:[#allocation2 + $0x1c8] sm:$0xff] %vm196_vm1, %v4600_v50  ;;  %362 = vst.msk [vmem:[#allocation2 + $0x1d0] sm:$0xff] %vm196_vm1, %v4601_v51  ;;  %4931 = vmatmul.mubr.msk.f32.gmra.mrb[4].mxu1 %vm196_vm1, %v6070_v60  ;;  %5128 = vmatmul.mubr.msk.f32.gmra.mrb[2].mxu0 %vm196_vm1, %v6070_v60  ;;  %v6123_v6 = vld [vmem:[#allocation2 + $0xe8] sm:$0xff]  ;;  %v6133_v7 = vld [vmem:[#allocation2 + $0xf0] sm:$0xff] }
  0x48   : > { %363 = vst.msk [vmem:[#allocation2 + $0x1e8] sm:$0xff] %vm196_vm1, %v4604_v52  ;;  %364 = vst.msk [vmem:[#allocation2 + $0x1f0] sm:$0xff] %vm196_vm1, %v4605_v53  ;;  %4933 = vmatprep.mubr.msk.f32.mxu1 %vm196_vm1, %v6074_v61  ;;  %5130 = vmatprep.mubr.msk.f32.mxu0 %vm196_vm1, %v6074_v61  ;;  %v6135_v8 = vld [vmem:[#allocation2 + $0x108] sm:$0xff]  ;;  %v6145_v9 = vld [vmem:[#allocation2 + $0x110] sm:$0xff] }
  0x49   : > { %365 = vst.msk [vmem:[#allocation2 + $0x208] sm:$0xff] %vm196_vm1, %v4608_v54  ;;  %366 = vst.msk [vmem:[#allocation2 + $0x210] sm:$0xff] %vm196_vm1, %v4609_v55  ;;  %v6147_v10 = vld [vmem:[#allocation2 + $0x128] sm:$0xff]  ;;  %v6159_v12 = vld [vmem:[#allocation2 + $0x130] sm:$0xff] }
  0x4a   : > { %7110 = vst [vmem:[#allocation6_spill] sm:$0xff] %v6145_v9  ;;  %7111 = vst [vmem:[#allocation7_spill] sm:$0xff] %v6147_v10  ;;  %v6149_v11 = vld [vmem:[#allocation2 + $0x29] sm:$0xff]  ;;  %v6161_v13 = vld [vmem:[#allocation2 + $0x31] sm:$0xff] }
  0x4b   : > { %4934 = vmatmul.mubr.msk.f32.gmra.mrb[6].mxu1 %vm196_vm1, %v6085_v62  ;;  %5131 = vmatmul.mubr.msk.f32.gmra.mrb[4].mxu0 %vm196_vm1, %v6085_v62  ;;  %7112 = vst [vmem:[#allocation8_spill] sm:$0xff] %v6159_v12  ;;  %v6163_v14 = vld [vmem:[#allocation2 + $0x148] sm:$0xff]  ;;  %v6179_v18 = vld [vmem:[#allocation2 + $0x150] sm:$0xff] }
  0x4c   : > { %4936 = vmatprep.mubr.msk.f32.mxu1 %vm196_vm1, %v6087_v63  ;;  %5133 = vmatprep.mubr.msk.f32.mxu0 %vm196_vm1, %v6087_v63  ;;  %7113 = vst [vmem:[#allocation9_spill] sm:$0xff] %v6163_v14  ;;  %v6165_v16 = vld [vmem:[#allocation2 + $0x49] sm:$0xff]  ;;  %7114 = vst [vmem:[#allocation10_spill] sm:$0xff] %v6179_v18  ;;  %v6181_v19 = vld [vmem:[#allocation2 + $0x51] sm:$0xff] }
  0x4d   : > { %v6185_v20 = vld [vmem:[#allocation2 + $0x168] sm:$0xff]  ;;  %v6199_v22 = vld [vmem:[#allocation2 + $0x170] sm:$0xff] }
  0x4e   : > { %7115 = vst [vmem:[#allocation11_spill] sm:$0xff] %v6185_v20  ;;  %v6187_v21 = vld [vmem:[#allocation2 + $0x69] sm:$0xff]  ;;  %7116 = vst [vmem:[#allocation12_spill] sm:$0xff] %v6199_v22  ;;  %v6201_v23 = vld [vmem:[#allocation2 + $0x71] sm:$0xff] }
  0x4f   : > { %4937 = vmatmul.mubr.msk.f32.gmra.mrb[8].mxu1 %vm196_vm1, %v6097_v0  ;;  %5134 = vmatmul.mubr.msk.f32.gmra.mrb[6].mxu0 %vm196_vm1, %v6097_v0  ;;  %v6203_v24 = vld [vmem:[#allocation2 + $0x188] sm:$0xff]  ;;  %v6215_v26 = vld [vmem:[#allocation2 + $0x190] sm:$0xff] }
  0x50   : > { %4939 = vmatprep.mubr.msk.f32.mxu1 %vm196_vm1, %v6099_v1  ;;  %5136 = vmatprep.mubr.msk.f32.mxu0 %vm196_vm1, %v6099_v1  ;;  %7117 = vst [vmem:[#allocation13_spill] sm:$0xff] %v6203_v24  ;;  %v6205_v25 = vld [vmem:[#allocation2 + $0x89] sm:$0xff]  ;;  %7118 = vst [vmem:[#allocation14_spill] sm:$0xff] %v6215_v26  ;;  %v6217_v27 = vld [vmem:[#allocation2 + $0x91] sm:$0xff] }
  0x51   : > { %v6219_v28 = vld [vmem:[#allocation2 + $0x1a8] sm:$0xff]  ;;  %v6231_v30 = vld [vmem:[#allocation2 + $0x1b0] sm:$0xff] }
  0x52   : > { %7119 = vst [vmem:[#allocation15_spill] sm:$0xff] %v6219_v28  ;;  %v6221_v29 = vld [vmem:[#allocation2 + $0xa9] sm:$0xff]  ;;  %7120 = vst [vmem:[#allocation16_spill] sm:$0xff] %v6231_v30  ;;  %v6233_v31 = vld [vmem:[#allocation2 + $0xb1] sm:$0xff] }
  0x53   : > { %4940 = vmatmul.mubr.msk.f32.gmra.mrb[10].mxu1 %vm196_vm1, %v6109_v3  ;;  %5137 = vmatmul.mubr.msk.f32.gmra.mrb[8].mxu0 %vm196_vm1, %v6109_v3  ;;  %v6235_v32 = vld [vmem:[#allocation2 + $0x1c8] sm:$0xff]  ;;  %v6247_v34 = vld [vmem:[#allocation2 + $0x1d0] sm:$0xff] }
  0x54   : > { %4942 = vmatprep.mubr.msk.f32.mxu1 %vm196_vm1, %v6111_v4  ;;  %5139 = vmatprep.mubr.msk.f32.mxu0 %vm196_vm1, %v6111_v4  ;;  %7121 = vst [vmem:[#allocation17_spill] sm:$0xff] %v6235_v32  ;;  %v6237_v33 = vld [vmem:[#allocation2 + $0xc9] sm:$0xff]  ;;  %7122 = vst [vmem:[#allocation18_spill] sm:$0xff] %v6247_v34  ;;  %v6249_v35 = vld [vmem:[#allocation2 + $0xd1] sm:$0xff] }
  0x55   : > { %v6251_v36 = vld [vmem:[#allocation2 + $0x1e8] sm:$0xff]  ;;  %v6263_v38 = vld [vmem:[#allocation2 + $0x1f0] sm:$0xff] }
  0x56   : > { %7123 = vst [vmem:[#allocation19_spill] sm:$0xff] %v6251_v36  ;;  %v6253_v37 = vld [vmem:[#allocation2 + $0xe9] sm:$0xff]  ;;  %7124 = vst [vmem:[#allocation20_spill] sm:$0xff] %v6263_v38  ;;  %v6265_v39 = vld [vmem:[#allocation2 + $0xf1] sm:$0xff] }
  0x57   : > { %4943 = vmatmul.mubr.msk.f32.gmra.mrb[12].mxu1 %vm196_vm1, %v6121_v5  ;;  %5140 = vmatmul.mubr.msk.f32.gmra.mrb[10].mxu0 %vm196_vm1, %v6121_v5  ;;  %v367_v40 = vld [vmem:[#allocation2 + $0x7] sm:$0xff]  ;;  %v6276_v43 = vld [vmem:[#allocation2 + $0x111] sm:$0xff] }
  0x58   : > { %4945 = vmatprep.mubr.msk.f32.mxu1 %vm196_vm1, %v6123_v6  ;;  %5142 = vmatprep.mubr.msk.f32.mxu0 %vm196_vm1, %v6123_v6  ;;  %v6267_v41 = vld [vmem:[#allocation2 + $0x109] sm:$0xff]  ;;  %v6296_v48 = vld [vmem:[#allocation2 + $0x131] sm:$0xff] }
  0x59   : > { %v6278_v44 = vld [vmem:[#allocation2 + $0x27] sm:$0xff]  ;;  %v6294_v47 = vld [vmem:[#allocation2 + $0x2f] sm:$0xff] }
  0x5a   : > { %7125 = vst [vmem:[#allocation21_spill] sm:$0xff] %v6278_v44  ;;  %v6280_v45 = vld [vmem:[#allocation2 + $0x129] sm:$0xff]  ;;  %7126 = vst [vmem:[#allocation22_spill] sm:$0xff] %v6294_v47  ;;  %v6316_v51 = vld [vmem:[#allocation2 + $0x151] sm:$0xff] }
  0x5b   : > { %4946 = vmatmul.mubr.msk.f32.gmra.mrb[14].mxu1 %vm196_vm1, %v6133_v7  ;;  %5143 = vmatmul.mubr.msk.f32.gmra.mrb[12].mxu0 %vm196_vm1, %v6133_v7  ;;  %v6288_v46 = vld [vmem:[%s7059_s1 + $0xc] sm:$0x7]  ;;  %v6330_v54 = vld [vmem:[#allocation2 + $0x6f] sm:$0xff] }
  0x5c   : > { %4948 = vmatprep.mubr.msk.f32.mxu1 %vm196_vm1, %v6135_v8  ;;  %5145 = vmatprep.mubr.msk.f32.mxu0 %vm196_vm1, %v6135_v8  ;;  %v6300_v49 = vld [vmem:[#allocation2 + $0x47] sm:$0xff]  ;;  %7130 = vst [vmem:[#allocation26_spill] sm:$0xff] %v6330_v54  ;;  %v6332_v55 = vld [vmem:[#allocation2 + $0x171] sm:$0xff] }
  0x5d   : > { %7127 = vst [vmem:[#allocation23_spill] sm:$0xff] %v6300_v49  ;;  %v6302_v50 = vld [vmem:[#allocation2 + $0x149] sm:$0xff] }
  0x5e   : > { %v6318_v52 = vld [vmem:[#allocation2 + $0x67] sm:$0xff] }
  0x5f   : > { %4949 = vmatmul.mubr.msk.f32.gmra.mrb[16].mxu1 %vm196_vm1, %v6145_v9  ;;  %5146 = vmatmul.mubr.msk.f32.gmra.mrb[14].mxu0 %vm196_vm1, %v6145_v9  ;;  %7129 = vst [vmem:[#allocation25_spill] sm:$0xff] %v6318_v52  ;;  %v6320_v53 = vld [vmem:[#allocation2 + $0x169] sm:$0xff] }
  0x60   : > { %4951 = vmatprep.mubr.msk.f32.mxu1 %vm196_vm1, %v6147_v10  ;;  %5174 = vmatprep.mubr.msk.f32.mxu0 %vm196_vm1, %v6149_v11  ;;  %v6334_v56 = vld [vmem:[#allocation2 + $0x87] sm:$0xff]  ;;  %v6412_v10 = vld [vmem:[#allocation2 + $0x211] sm:$0xff] }
  0x61   : > { %7131 = vst [vmem:[#allocation27_spill] sm:$0xff] %v6334_v56  ;;  %v6336_v57 = vld [vmem:[#allocation2 + $0x189] sm:$0xff]  ;;  %7140 = vst [vmem:[#allocation36_spill] sm:$0xff] %v6412_v10 }
  0x62   : > { %v6424_v9 = vld [vmem:[#allocation2 + $0x12f] sm:$0xff] }
  0x63   : > { %4952 = vmatmul.mubr.msk.f32.gmra.mrb[18].mxu1 %vm196_vm1, %v6159_v12  ;;  %5175 = vmatmul.mubr.msk.f32.vlgmr.msra.gmra.mrb[0].mxu0 %vm196_vm1, %v6161_v13  ;;  %v6400_v12 = vld [vmem:[#allocation2 + $0x209] sm:$0xff] }
  0x64   : > { %5223 = vmatpush3.msk.msra.mxu0 %vm530_vm0, %v4371_v59  ;;  %4954 = vmatprep.mubr.msk.f32.mxu1 %vm196_vm1, %v6163_v14  ;;  %v6346_v59 = vld [vmem:[#allocation2 + $0x8f] sm:$0xff]  ;;  %v6398_v14 = vld [vmem:[#allocation2 + $0x107] sm:$0xff]  ;;  %7139 = vst [vmem:[#allocation35_spill] sm:$0xff] %v6400_v12 }
  0x65   : > { %5177 = vmatprep.mubr.msk.f32.mxu0 %vm196_vm1, %v6165_v16  ;;  %5272 = vmatprep.subr.msk.mxu0 %vm530_vm0, %v6170_v17  ;;  %7132 = vst [vmem:[#allocation28_spill] sm:$0xff] %v6346_v59 }
  0x67   : > { %4955 = vmatmul.mubr.msk.f32.gmra.mrb[20].mxu1 %vm196_vm1, %v6179_v18  ;;  %5178 = vmatmul.mubr.msk.f32.gmra.mrb[2].mxu0 %vm196_vm1, %v6181_v19  ;;  %v6396_v18 = vld [vmem:[#allocation2 + $0x1f1] sm:$0xff] }
  0x68   : > { %4957 = vmatprep.mubr.msk.f32.mxu1 %vm196_vm1, %v6185_v20  ;;  %5180 = vmatprep.mubr.msk.f32.mxu0 %vm196_vm1, %v6187_v21  ;;  %v6394_v20 = vld [vmem:[#allocation2 + $0xef] sm:$0xff]  ;;  %7138 = vst [vmem:[#allocation34_spill] sm:$0xff] %v6396_v18 }
  0x69   : > { %7137 = vst [vmem:[#allocation33_spill] sm:$0xff] %v6394_v20 }
  0x6b   : > { %4958 = vmatmul.mubr.msk.f32.gmra.mrb[22].mxu1 %vm196_vm1, %v6199_v22  ;;  %5181 = vmatmul.mubr.msk.f32.gmra.mrb[4].mxu0 %vm196_vm1, %v6201_v23  ;;  %v6384_v22 = vld [vmem:[#allocation2 + $0x1e9] sm:$0xff] }
  0x6c   : > { %4960 = vmatprep.mubr.msk.f32.mxu1 %vm196_vm1, %v6203_v24  ;;  %5183 = vmatprep.mubr.msk.f32.mxu0 %vm196_vm1, %v6205_v25  ;;  %v6382_v24 = vld [vmem:[#allocation2 + $0xe7] sm:$0xff] }
  0x6f   : > { %4961 = vmatmul.mubr.msk.f32.gmra.mrb[24].mxu1 %vm196_vm1, %v6215_v26  ;;  %5184 = vmatmul.mubr.msk.f32.gmra.mrb[6].mxu0 %vm196_vm1, %v6217_v27  ;;  %v6380_v26 = vld [vmem:[#allocation2 + $0x1d1] sm:$0xff] }
  0x70   : > { %4963 = vmatprep.mubr.msk.f32.mxu1 %vm196_vm1, %v6219_v28  ;;  %5186 = vmatprep.mubr.msk.f32.mxu0 %vm196_vm1, %v6221_v29  ;;  %v6378_v28 = vld [vmem:[#allocation2 + $0xcf] sm:$0xff] }
  0x71   : > { %7136 = vst [vmem:[#allocation32_spill] sm:$0xff] %v6378_v28 }
  0x73   : > { %4964 = vmatmul.mubr.msk.f32.gmra.mrb[26].mxu1 %vm196_vm1, %v6231_v30  ;;  %5187 = vmatmul.mubr.msk.f32.gmra.mrb[8].mxu0 %vm196_vm1, %v6233_v31  ;;  %v6368_v30 = vld [vmem:[#allocation2 + $0x1c9] sm:$0xff] }
  0x74   : > { %4966 = vmatprep.mubr.msk.f32.mxu1 %vm196_vm1, %v6235_v32  ;;  %5189 = vmatprep.mubr.msk.f32.mxu0 %vm196_vm1, %v6237_v33  ;;  %v6366_v32 = vld [vmem:[#allocation2 + $0xc7] sm:$0xff] }
  0x75   : > { %7135 = vst [vmem:[#allocation31_spill] sm:$0xff] %v6366_v32 }
  0x77   : > { %4967 = vmatmul.mubr.msk.f32.gmra.mrb[28].mxu1 %vm196_vm1, %v6247_v34  ;;  %5190 = vmatmul.mubr.msk.f32.gmra.mrb[10].mxu0 %vm196_vm1, %v6249_v35  ;;  %v6364_v34 = vld [vmem:[#allocation2 + $0x1b1] sm:$0xff] }
  0x78   : > { %4969 = vmatprep.mubr.msk.f32.mxu1 %vm196_vm1, %v6251_v36  ;;  %5192 = vmatprep.mubr.msk.f32.mxu0 %vm196_vm1, %v6253_v37  ;;  %v6362_v36 = vld [vmem:[#allocation2 + $0xaf] sm:$0xff] }
  0x79   : > { %7134 = vst [vmem:[#allocation30_spill] sm:$0xff] %v6362_v36 }
  0x7b   : > { %4970 = vmatmul.mubr.msk.f32.gmra.mrb[30].mxu1 %vm196_vm1, %v6263_v38  ;;  %5193 = vmatmul.mubr.msk.f32.gmra.mrb[12].mxu0 %vm196_vm1, %v6265_v39  ;;  %v6352_v38 = vld [vmem:[#allocation2 + $0x1a9] sm:$0xff] }
  0x7c   : > { %4974 = vmatprep.mubr.msk.f32.mxu1 %vm196_vm1, %v367_v40  ;;  %5195 = vmatprep.mubr.msk.f32.mxu0 %vm196_vm1, %v6267_v41  ;;  %v6348_v40 = vld [vmem:[#allocation2 + $0x191] sm:$0xff] }
  0x7f   : > { %4975 = vmatmul.mubr.msk.f32.vlgmr.msra.gmra.mrb[0].mxu1 %vm196_vm1, %v368_v42  ;;  %5196 = vmatmul.mubr.msk.f32.gmra.mrb[14].mxu0 %vm196_vm1, %v6276_v43  ;;  %v6350_v42 = vld [vmem:[#allocation2 + $0xa7] sm:$0xff] }
  0x80   : > { %4977 = vmatprep.mubr.msk.f32.mxu1 %vm196_vm1, %v6278_v44  ;;  %5198 = vmatprep.mubr.msk.f32.mxu0 %vm196_vm1, %v6280_v45  ;;  %7133 = vst [vmem:[#allocation29_spill] sm:$0xff] %v6350_v42  ;;  %v6414_v44 = vld [vmem:[#allocation2 + $0x127] sm:$0xff] }
  0x81   : > { %5023 = vmatpush3.msk.msra.mxu1 %vm530_vm0, %v6007_v15  ;;  %v6314_v15 = vld [vmem:[#allocation2 + $0x4f] sm:$0xff] }
  0x82   : > { %5072 = vmatprep.subr.msk.mxu1 %vm530_vm0, %v6288_v46  ;;  %7128 = vst [vmem:[#allocation24_spill] sm:$0xff] %v6314_v15 }
  0x83   : > { %4978 = vmatmul.mubr.msk.f32.gmra.mrb[2].mxu1 %vm196_vm1, %v6294_v47  ;;  %5199 = vmatmul.mubr.msk.f32.gmra.mrb[16].mxu0 %vm196_vm1, %v6296_v48  ;;  %v6410_v47 = vld [vmem:[#allocation2 + $0x10f] sm:$0xff] }
  0x84   : > { %4980 = vmatprep.mubr.msk.f32.mxu1 %vm196_vm1, %v6300_v49  ;;  %5201 = vmatprep.mubr.msk.f32.mxu0 %vm196_vm1, %v6302_v50 }
  0x87   : > { %4981 = vmatmul.mubr.msk.f32.gmra.mrb[4].mxu1 %vm196_vm1, %v6314_v15  ;;  %5202 = vmatmul.mubr.msk.f32.gmra.mrb[18].mxu0 %vm196_vm1, %v6316_v51 }
  0x88   : > { %4983 = vmatprep.mubr.msk.f32.mxu1 %vm196_vm1, %v6318_v52  ;;  %5204 = vmatprep.mubr.msk.f32.mxu0 %vm196_vm1, %v6320_v53 }
  0x8b   : > { %4984 = vmatmul.mubr.msk.f32.gmra.mrb[6].mxu1 %vm196_vm1, %v6330_v54  ;;  %5205 = vmatmul.mubr.msk.f32.gmra.mrb[20].mxu0 %vm196_vm1, %v6332_v55 }
  0x8c   : > { %4986 = vmatprep.mubr.msk.f32.mxu1 %vm196_vm1, %v6334_v56  ;;  %5207 = vmatprep.mubr.msk.f32.mxu0 %vm196_vm1, %v6336_v57 }
  0x8f   : > { %4987 = vmatmul.mubr.msk.f32.gmra.mrb[8].mxu1 %vm196_vm1, %v6346_v59  ;;  %5208 = vmatmul.mubr.msk.f32.gmra.mrb[22].mxu0 %vm196_vm1, %v6348_v40 }
  0x90   : > { %4989 = vmatprep.mubr.msk.f32.mxu1 %vm196_vm1, %v6350_v42  ;;  %5210 = vmatprep.mubr.msk.f32.mxu0 %vm196_vm1, %v6352_v38 }
  0x93   : > { %4990 = vmatmul.mubr.msk.f32.gmra.mrb[10].mxu1 %vm196_vm1, %v6362_v36  ;;  %5211 = vmatmul.mubr.msk.f32.gmra.mrb[24].mxu0 %vm196_vm1, %v6364_v34 }
  0x94   : > { %4992 = vmatprep.mubr.msk.f32.mxu1 %vm196_vm1, %v6366_v32  ;;  %5213 = vmatprep.mubr.msk.f32.mxu0 %vm196_vm1, %v6368_v30 }
  0x97   : > { %4993 = vmatmul.mubr.msk.f32.gmra.mrb[12].mxu1 %vm196_vm1, %v6378_v28  ;;  %5214 = vmatmul.mubr.msk.f32.gmra.mrb[26].mxu0 %vm196_vm1, %v6380_v26 }
  0x98   : > { %4995 = vmatprep.mubr.msk.f32.mxu1 %vm196_vm1, %v6382_v24  ;;  %5216 = vmatprep.mubr.msk.f32.mxu0 %vm196_vm1, %v6384_v22 }
  0x9b   : > { %4996 = vmatmul.mubr.msk.f32.gmra.mrb[14].mxu1 %vm196_vm1, %v6394_v20  ;;  %5217 = vmatmul.mubr.msk.f32.gmra.mrb[28].mxu0 %vm196_vm1, %v6396_v18  ;;  %v6431_v18 = vld [vmem:[%s7059_s1 + $0x20] sm:$0x7] }
  0x9c   : > { %4998 = vmatprep.mubr.msk.f32.mxu1 %vm196_vm1, %v6398_v14  ;;  %5219 = vmatprep.mubr.msk.f32.mxu0 %vm196_vm1, %v6400_v12  ;;  %v6426_v12 = vld [vmem:[#allocation2 + $0x147] sm:$0xff] }
  0x9f   : > { %4999 = vmatmul.mubr.msk.f32.gmra.mrb[16].mxu1 %vm196_vm1, %v6410_v47  ;;  %5220 = vmatmul.mubr.msk.f32.gmra.mrb[30].mxu0 %vm196_vm1, %v6412_v10  ;;  %v6441_v10 = vld [vmem:[#allocation2 + $0x14f] sm:$0xff] }
  0xa0   : > { %5001 = vmatprep.mubr.msk.f32.mxu1 %vm196_vm1, %v6414_v44  ;;  %5224 = vmatprep.mubr.msk.f32.mxu0 %vm196_vm1, %v6300_v49  ;;  %v6445_v49 = vld [vmem:[#allocation2 + $0x167] sm:$0xff] }
  0xa3   : > { %5002 = vmatmul.mubr.msk.f32.gmra.mrb[18].mxu1 %vm196_vm1, %v6424_v9  ;;  %5225 = vmatmul.mubr.msk.f32.vlgmr.msra.gmra.mrb[0].mxu0 %vm196_vm1, %v6314_v15  ;;  %v6471_v15 = vld [vmem:[#allocation2 + $0x1a7] sm:$0xff] }
  0xa4   : > { %5273 = vmatpush3.msk.msra.mxu0 %vm530_vm0, %v6170_v17  ;;  %5004 = vmatprep.mubr.msk.f32.mxu1 %vm196_vm1, %v6426_v12  ;;  %v6457_v17 = vld [vmem:[#allocation2 + $0x16f] sm:$0xff] }
  0xa5   : > { %5227 = vmatprep.mubr.msk.f32.mxu0 %vm196_vm1, %v6318_v52  ;;  %5322 = vmatprep.subr.msk.mxu0 %vm530_vm0, %v6431_v18  ;;  %v6459_v52 = vld [vmem:[#allocation2 + $0x187] sm:$0xff] }
  0xa7   : > { %5005 = vmatmul.mubr.msk.f32.gmra.mrb[20].mxu1 %vm196_vm1, %v6441_v10  ;;  %5228 = vmatmul.mubr.msk.f32.gmra.mrb[2].mxu0 %vm196_vm1, %v6330_v54  ;;  %v6469_v54 = vld [vmem:[#allocation2 + $0x18f] sm:$0xff] }
  0xa8   : > { %5007 = vmatprep.mubr.msk.f32.mxu1 %vm196_vm1, %v6445_v49  ;;  %5230 = vmatprep.mubr.msk.f32.mxu0 %vm196_vm1, %v6334_v56  ;;  %v6483_v56 = vld [vmem:[#allocation2 + $0x1c7] sm:$0xff] }
  0xab   : > { %5008 = vmatmul.mubr.msk.f32.gmra.mrb[22].mxu1 %vm196_vm1, %v6457_v17  ;;  %5231 = vmatmul.mubr.msk.f32.gmra.mrb[4].mxu0 %vm196_vm1, %v6346_v59  ;;  %v6481_v59 = vld [vmem:[#allocation2 + $0x1af] sm:$0xff] }
  0xac   : > { %5010 = vmatprep.mubr.msk.f32.mxu1 %vm196_vm1, %v6459_v52  ;;  %5233 = vmatprep.mubr.msk.f32.mxu0 %vm196_vm1, %v6350_v42  ;;  %v6495_v42 = vld [vmem:[#allocation2 + $0x1e7] sm:$0xff] }
  0xaf   : > { %5011 = vmatmul.mubr.msk.f32.gmra.mrb[24].mxu1 %vm196_vm1, %v6469_v54  ;;  %5234 = vmatmul.mubr.msk.f32.gmra.mrb[6].mxu0 %vm196_vm1, %v6362_v36  ;;  %v6493_v36 = vld [vmem:[#allocation2 + $0x1cf] sm:$0xff] }
  0xb0   : > { %5013 = vmatprep.mubr.msk.f32.mxu1 %vm196_vm1, %v6471_v15  ;;  %5236 = vmatprep.mubr.msk.f32.mxu0 %vm196_vm1, %v6366_v32  ;;  %v1083_v32 = vld [vmem:[#allocation2 + $0x9] sm:$0xff] }
  0xb3   : > { %5014 = vmatmul.mubr.msk.f32.gmra.mrb[26].mxu1 %vm196_vm1, %v6481_v59  ;;  %5237 = vmatmul.mubr.msk.f32.gmra.mrb[8].mxu0 %vm196_vm1, %v6378_v28  ;;  %v6505_v28 = vld [vmem:[#allocation2 + $0x1ef] sm:$0xff] }
  0xb4   : > { %5016 = vmatprep.mubr.msk.f32.mxu1 %vm196_vm1, %v6483_v56  ;;  %5239 = vmatprep.mubr.msk.f32.mxu0 %vm196_vm1, %v6382_v24 }
  0xb7   : > { %5017 = vmatmul.mubr.msk.f32.gmra.mrb[28].mxu1 %vm196_vm1, %v6493_v36  ;;  %5240 = vmatmul.mubr.msk.f32.gmra.mrb[10].mxu0 %vm196_vm1, %v6394_v20  ;;  %v1084_v20 = vld [vmem:[#allocation2 + $0x11] sm:$0xff] }
  0xb8   : > { %5019 = vmatprep.mubr.msk.f32.mxu1 %vm196_vm1, %v6495_v42  ;;  %5242 = vmatprep.mubr.msk.f32.mxu0 %vm196_vm1, %v6398_v14 }
  0xbb   : > { %5020 = vmatmul.mubr.msk.f32.gmra.mrb[30].mxu1 %vm196_vm1, %v6505_v28  ;;  %5243 = vmatmul.mubr.msk.f32.gmra.mrb[12].mxu0 %vm196_vm1, %v6410_v47 }
  0xbc   : > { %5024 = vmatprep.mubr.msk.f32.mxu1 %vm196_vm1, %v1083_v32  ;;  %5245 = vmatprep.mubr.msk.f32.mxu0 %vm196_vm1, %v6414_v44  ;;  %v2675_v32 = vld [vmem:[#allocation2 + $0x22f] sm:$0xff] }
  0xbf   : > { %5025 = vmatmul.mubr.msk.f32.vlgmr.msra.gmra.mrb[0].mxu1 %vm196_vm1, %v1084_v20  ;;  %5246 = vmatmul.mubr.msk.f32.gmra.mrb[14].mxu0 %vm196_vm1, %v6424_v9  ;;  %v2674_v20 = vld [vmem:[#allocation2 + $0x227] sm:$0xff] }
  0xc0   : > { %5027 = vmatprep.mubr.msk.f32.mxu1 %vm196_vm1, %v6149_v11  ;;  %5248 = vmatprep.mubr.msk.f32.mxu0 %vm196_vm1, %v6426_v12  ;;  %v6565_v11 = vld [vmem:[#allocation2 + $0x207] sm:$0xff] }
  0xc1   : > { %5073 = vmatpush3.msk.msra.mxu1 %vm530_vm0, %v6288_v46  ;;  %v7155_v46 = vld [vmem:[#allocation27_spill] sm:$0xff] }
  0xc2   : > { %5372 = vmatprep.subr.msk.mxu1 %vm530_vm0, %v5932_v2 }
  0xc3   : > { %5028 = vmatmul.mubr.msk.f32.gmra.mrb[2].mxu1 %vm196_vm1, %v6161_v13  ;;  %5249 = vmatmul.mubr.msk.f32.gmra.mrb[16].mxu0 %vm196_vm1, %v6441_v10  ;;  %v6575_v13 = vld [vmem:[#allocation2 + $0x20f] sm:$0xff] }
  0xc4   : > { %5030 = vmatprep.mubr.msk.f32.mxu1 %vm196_vm1, %v6165_v16  ;;  %5251 = vmatprep.mubr.msk.f32.mxu0 %vm196_vm1, %v6445_v49 }
  0xc7   : > { %5031 = vmatmul.mubr.msk.f32.gmra.mrb[4].mxu1 %vm196_vm1, %v6181_v19  ;;  %5252 = vmatmul.mubr.msk.f32.gmra.mrb[18].mxu0 %vm196_vm1, %v6457_v17 }
  0xc8   : > { %5033 = vmatprep.mubr.msk.f32.mxu1 %vm196_vm1, %v6187_v21  ;;  %5254 = vmatprep.mubr.msk.f32.mxu0 %vm196_vm1, %v6459_v52 }
  0xcb   : > { %5034 = vmatmul.mubr.msk.f32.gmra.mrb[6].mxu1 %vm196_vm1, %v6201_v23  ;;  %5255 = vmatmul.mubr.msk.f32.gmra.mrb[20].mxu0 %vm196_vm1, %v6469_v54 }
  0xcc   : > { %5036 = vmatprep.mubr.msk.f32.mxu1 %vm196_vm1, %v6205_v25  ;;  %5257 = vmatprep.mubr.msk.f32.mxu0 %vm196_vm1, %v6471_v15 }
  0xcf   : > { %5037 = vmatmul.mubr.msk.f32.gmra.mrb[8].mxu1 %vm196_vm1, %v6217_v27  ;;  %5258 = vmatmul.mubr.msk.f32.gmra.mrb[22].mxu0 %vm196_vm1, %v6481_v59 }
  0xd0   : > { %5039 = vmatprep.mubr.msk.f32.mxu1 %vm196_vm1, %v6221_v29  ;;  %5260 = vmatprep.mubr.msk.f32.mxu0 %vm196_vm1, %v6483_v56 }
  0xd3   : > { %5040 = vmatmul.mubr.msk.f32.gmra.mrb[10].mxu1 %vm196_vm1, %v6233_v31  ;;  %5261 = vmatmul.mubr.msk.f32.gmra.mrb[24].mxu0 %vm196_vm1, %v6493_v36 }
  0xd4   : > { %5042 = vmatprep.mubr.msk.f32.mxu1 %vm196_vm1, %v6237_v33  ;;  %5263 = vmatprep.mubr.msk.f32.mxu0 %vm196_vm1, %v6495_v42 }
  0xd7   : > { %5043 = vmatmul.mubr.msk.f32.gmra.mrb[12].mxu1 %vm196_vm1, %v6249_v35  ;;  %5264 = vmatmul.mubr.msk.f32.gmra.mrb[26].mxu0 %vm196_vm1, %v6505_v28 }
  0xd8   : > { %5045 = vmatprep.mubr.msk.f32.mxu1 %vm196_vm1, %v6253_v37  ;;  %5266 = vmatprep.mubr.msk.f32.mxu0 %vm196_vm1, %v6565_v11 }
  0xdb   : > { %5046 = vmatmul.mubr.msk.f32.gmra.mrb[14].mxu1 %vm196_vm1, %v6265_v39  ;;  %5267 = vmatmul.mubr.msk.f32.gmra.mrb[28].mxu0 %vm196_vm1, %v6575_v13 }
  0xdc   : > { %5048 = vmatprep.mubr.msk.f32.mxu1 %vm196_vm1, %v6267_v41  ;;  %5269 = vmatprep.mubr.msk.f32.mxu0 %vm196_vm1, %v2674_v20  ;;  %v7157_v20 = vld [vmem:[#allocation28_spill] sm:$0xff] }
  0xdf   : > { %5049 = vmatmul.mubr.msk.f32.gmra.mrb[16].mxu1 %vm196_vm1, %v6276_v43  ;;  %5270 = vmatmul.mubr.msk.f32.gmra.mrb[30].mxu0 %vm196_vm1, %v2675_v32  ;;  %v7158_v32 = vld [vmem:[#allocation14_spill] sm:$0xff] }
  0xe0   : > { %5051 = vmatprep.mubr.msk.f32.mxu1 %vm196_vm1, %v6280_v45  ;;  %5274 = vmatprep.mubr.msk.f32.mxu0 %vm196_vm1, %v6053_v58  ;;  %v7141_v58 = vld [vmem:[#allocation34_spill] sm:$0xff] }
  0xe3   : > { %5052 = vmatmul.mubr.msk.f32.gmra.mrb[18].mxu1 %vm196_vm1, %v6296_v48  ;;  %5275 = vmatmul.mubr.msk.f32.vlgmr.msra.gmra.mrb[0].mxu0 %vm196_vm1, %v6070_v60  ;;  %v7142_v60 = vld [vmem:[#allocation6_spill] sm:$0xff] }
  0xe4   : > { %5323 = vmatpush3.msk.msra.mxu0 %vm530_vm0, %v6431_v18  ;;  %5054 = vmatprep.mubr.msk.f32.mxu1 %vm196_vm1, %v6302_v50  ;;  %v7154_v18 = vld [vmem:[#allocation12_spill] sm:$0xff] }
  0xe5   : > { %5277 = vmatprep.mubr.msk.f32.mxu0 %vm196_vm1, %v6074_v61  ;;  %v7143_v61 = vld [vmem:[#allocation21_spill] sm:$0xff] }
  0xe7   : > { %5055 = vmatmul.mubr.msk.f32.gmra.mrb[20].mxu1 %vm196_vm1, %v6316_v51  ;;  %5278 = vmatmul.mubr.msk.f32.gmra.mrb[2].mxu0 %vm196_vm1, %v6085_v62  ;;  %v7144_v62 = vld [vmem:[#allocation7_spill] sm:$0xff] }
  0xe8   : > { %5057 = vmatprep.mubr.msk.f32.mxu1 %vm196_vm1, %v6320_v53  ;;  %5280 = vmatprep.mubr.msk.f32.mxu0 %vm196_vm1, %v6087_v63  ;;  %v7145_v63 = vld [vmem:[#allocation22_spill] sm:$0xff] }
  0xeb   : > { %5058 = vmatmul.mubr.msk.f32.gmra.mrb[22].mxu1 %vm196_vm1, %v6332_v55  ;;  %5281 = vmatmul.mubr.msk.f32.gmra.mrb[4].mxu0 %vm196_vm1, %v6097_v0  ;;  %v7146_v0 = vld [vmem:[#allocation8_spill] sm:$0xff] }
  0xec   : > { %5060 = vmatprep.mubr.msk.f32.mxu1 %vm196_vm1, %v6336_v57  ;;  %5283 = vmatprep.mubr.msk.f32.mxu0 %vm196_vm1, %v6099_v1  ;;  %v7147_v1 = vld [vmem:[#allocation23_spill] sm:$0xff] }
  0xef   : > { %5061 = vmatmul.mubr.msk.f32.gmra.mrb[24].mxu1 %vm196_vm1, %v6348_v40  ;;  %5284 = vmatmul.mubr.msk.f32.gmra.mrb[6].mxu0 %vm196_vm1, %v6109_v3  ;;  %v7148_v3 = vld [vmem:[#allocation9_spill] sm:$0xff] }
  0xf0   : > { %5063 = vmatprep.mubr.msk.f32.mxu1 %vm196_vm1, %v6352_v38  ;;  %5286 = vmatprep.mubr.msk.f32.mxu0 %vm196_vm1, %v6111_v4  ;;  %v7149_v4 = vld [vmem:[#allocation24_spill] sm:$0xff] }
  0xf3   : > { %5064 = vmatmul.mubr.msk.f32.gmra.mrb[26].mxu1 %vm196_vm1, %v6364_v34  ;;  %5287 = vmatmul.mubr.msk.f32.gmra.mrb[8].mxu0 %vm196_vm1, %v6121_v5  ;;  %v7150_v5 = vld [vmem:[#allocation10_spill] sm:$0xff] }
  0xf4   : > { %5066 = vmatprep.mubr.msk.f32.mxu1 %vm196_vm1, %v6368_v30  ;;  %5289 = vmatprep.mubr.msk.f32.mxu0 %vm196_vm1, %v6123_v6  ;;  %v7151_v6 = vld [vmem:[#allocation25_spill] sm:$0xff] }
  0xf7   : > { %5067 = vmatmul.mubr.msk.f32.gmra.mrb[28].mxu1 %vm196_vm1, %v6380_v26  ;;  %5290 = vmatmul.mubr.msk.f32.gmra.mrb[10].mxu0 %vm196_vm1, %v6133_v7  ;;  %v7152_v7 = vld [vmem:[#allocation11_spill] sm:$0xff] }
  0xf8   : > { %5069 = vmatprep.mubr.msk.f32.mxu1 %vm196_vm1, %v6384_v22  ;;  %5292 = vmatprep.mubr.msk.f32.mxu0 %vm196_vm1, %v6135_v8  ;;  %v7153_v8 = vld [vmem:[#allocation26_spill] sm:$0xff] }
  0xfb   : > { %5070 = vmatmul.mubr.msk.f32.gmra.mrb[30].mxu1 %vm196_vm1, %v7141_v58  ;;  %5293 = vmatmul.mubr.msk.f32.gmra.mrb[12].mxu0 %vm196_vm1, %v7142_v60  ;;  %v7159_v60 = vld [vmem:[#allocation29_spill] sm:$0xff] }
  0xfc   : > { %5074 = vmatprep.mubr.msk.f32.mxu1 %vm196_vm1, %v7143_v61  ;;  %5295 = vmatprep.mubr.msk.f32.mxu0 %vm196_vm1, %v7144_v62  ;;  %v7160_v61 = vld [vmem:[#allocation15_spill] sm:$0xff]  ;;  %v7161_v62 = vld [vmem:[#allocation30_spill] sm:$0xff] }
  0xff   : > { %5075 = vmatmul.mubr.msk.f32.vlgmr.msra.gmra.mrb[0].mxu1 %vm196_vm1, %v7145_v63  ;;  %5296 = vmatmul.mubr.msk.f32.gmra.mrb[14].mxu0 %vm196_vm1, %v7146_v0  ;;  %v7162_v63 = vld [vmem:[#allocation16_spill] sm:$0xff] }
 0x100   : > { %5077 = vmatprep.mubr.msk.f32.mxu1 %vm196_vm1, %v7147_v1  ;;  %5298 = vmatprep.mubr.msk.f32.mxu0 %vm196_vm1, %v7148_v3  ;;  %v7163_v1 = vld [vmem:[#allocation31_spill] sm:$0xff] }
 0x101   : > { %5373 = vmatpush3.msk.msra.mxu1 %vm530_vm0, %v5932_v2  ;;  %v7156_v2 = vld [vmem:[#allocation13_spill] sm:$0xff] }
 0x103   : > { %5078 = vmatmul.mubr.msk.f32.gmra.mrb[2].mxu1 %vm196_vm1, %v7149_v4  ;;  %5299 = vmatmul.mubr.msk.f32.gmra.mrb[16].mxu0 %vm196_vm1, %v7150_v5  ;;  %v7164_v4 = vld [vmem:[#allocation17_spill] sm:$0xff] }
 0x104   : > { %5080 = vmatprep.mubr.msk.f32.mxu1 %vm196_vm1, %v7151_v6  ;;  %5301 = vmatprep.mubr.msk.f32.mxu0 %vm196_vm1, %v7152_v7  ;;  %v7165_v6 = vld [vmem:[#allocation32_spill] sm:$0xff] }
 0x107   : > { %5081 = vmatmul.mubr.msk.f32.gmra.mrb[4].mxu1 %vm196_vm1, %v7153_v8  ;;  %5302 = vmatmul.mubr.msk.f32.gmra.mrb[18].mxu0 %vm196_vm1, %v7154_v18  ;;  %v7166_v8 = vld [vmem:[#allocation18_spill] sm:$0xff] }
 0x108   : > { %5083 = vmatprep.mubr.msk.f32.mxu1 %vm196_vm1, %v7155_v46  ;;  %5304 = vmatprep.mubr.msk.f32.mxu0 %vm196_vm1, %v7156_v2  ;;  %v7167_v46 = vld [vmem:[#allocation19_spill] sm:$0xff] }
 0x10b   : > { %5084 = vmatmul.mubr.msk.f32.gmra.mrb[6].mxu1 %vm196_vm1, %v7157_v20  ;;  %5305 = vmatmul.mubr.msk.f32.gmra.mrb[20].mxu0 %vm196_vm1, %v7158_v32  ;;  %v6699_v20 = vld [vmem:[#allocation2 + $0x208] sm:$0xff] }
 0x10c   : > { %5086 = vmatprep.mubr.msk.f32.mxu1 %vm196_vm1, %v7159_v60  ;;  %5307 = vmatprep.mubr.msk.f32.mxu0 %vm196_vm1, %v7160_v61  ;;  %v7168_v60 = vld [vmem:[#allocation33_spill] sm:$0xff] }
 0x10f   : > { %5087 = vmatmul.mubr.msk.f32.gmra.mrb[8].mxu1 %vm196_vm1, %v7161_v62  ;;  %5308 = vmatmul.mubr.msk.f32.gmra.mrb[22].mxu0 %vm196_vm1, %v7162_v63  ;;  %v7169_v62 = vld [vmem:[#allocation20_spill] sm:$0xff] }
 0x110   : > { %5089 = vmatprep.mubr.msk.f32.mxu1 %vm196_vm1, %v7163_v1  ;;  %5310 = vmatprep.mubr.msk.f32.mxu0 %vm196_vm1, %v7164_v4  ;;  %v6709_v1 = vld [vmem:[#allocation2 + $0x210] sm:$0xff] }
 0x113   : > { %5090 = vmatmul.mubr.msk.f32.gmra.mrb[10].mxu1 %vm196_vm1, %v7165_v6  ;;  %5311 = vmatmul.mubr.msk.f32.gmra.mrb[24].mxu0 %vm196_vm1, %v7166_v8  ;;  %v3065_v6 = vld [vmem:[#allocation2 + $0x230] sm:$0xff] }
 0x114   : > { %5092 = vmatprep.mubr.msk.f32.mxu1 %vm196_vm1, %v6382_v24  ;;  %5313 = vmatprep.mubr.msk.f32.mxu0 %vm196_vm1, %v7167_v46  ;;  %v3064_v24 = vld [vmem:[#allocation2 + $0x228] sm:$0xff] }
 0x117   : > { %5093 = vmatmul.mubr.msk.f32.gmra.mrb[12].mxu1 %vm196_vm1, %v7168_v60  ;;  %5314 = vmatmul.mubr.msk.f32.gmra.mrb[26].mxu0 %vm196_vm1, %v7169_v62 }
 0x118   : > { %5095 = vmatprep.mubr.msk.f32.mxu1 %vm196_vm1, %v6398_v14  ;;  %5316 = vmatprep.mubr.msk.f32.mxu0 %vm196_vm1, %v6699_v20  ;;  %v7171_v14 = vld [vmem:[#allocation36_spill] sm:$0xff] }
 0x11b   : > { %5096 = vmatmul.mubr.msk.f32.gmra.mrb[14].mxu1 %vm196_vm1, %v6410_v47  ;;  %5317 = vmatmul.mubr.msk.f32.gmra.mrb[28].mxu0 %vm196_vm1, %v6709_v1 }
 0x11c   : > { %5098 = vmatprep.mubr.msk.f32.mxu1 %vm196_vm1, %v6414_v44  ;;  %5319 = vmatprep.mubr.msk.f32.mxu0 %vm196_vm1, %v3064_v24  ;;  %v6865_v44 = vld [vmem:[%s7061_s3] ss:$0 sm:$0xff] }
 0x11f   : > { %5099 = vmatmul.mubr.msk.f32.gmra.mrb[16].mxu1 %vm196_vm1, %v6424_v9  ;;  %5320 = vmatmul.mubr.msk.f32.gmra.mrb[30].mxu0 %vm196_vm1, %v3065_v6  ;;  %v1879_v9 = vld [vmem:[#allocation2 + $0x128] sm:$0xff] }
 0x120   : > { %5101 = vmatprep.mubr.msk.f32.mxu1 %vm196_vm1, %v6426_v12  ;;  %5324 = vmatprep.mubr.msk.f32.mxu0 %vm196_vm1, %v6165_v16  ;;  %v3454_v12 = vld [vmem:[#allocation2 + $0x229] sm:$0xff]  ;;  %v3455_v16 = vld [vmem:[#allocation2 + $0x231] sm:$0xff] }
 0x123   : > { %5102 = vmatmul.mubr.msk.f32.gmra.mrb[18].mxu1 %vm196_vm1, %v6441_v10  ;;  %5325 = vmatmul.mubr.msk.f32.vlgmr.msra.gmra.mrb[0].mxu0 %vm196_vm1, %v6181_v19  ;;  %v7170_v10 = vld [vmem:[#allocation35_spill] sm:$0xff] }
 0x124   : > { %5104 = vmatprep.mubr.msk.f32.mxu1 %vm196_vm1, %v6445_v49  ;;  %5327 = vmatprep.mubr.msk.f32.mxu0 %vm196_vm1, %v6187_v21 }
 0x127   : > { %5105 = vmatmul.mubr.msk.f32.gmra.mrb[20].mxu1 %vm196_vm1, %v6457_v17  ;;  %5328 = vmatmul.mubr.msk.f32.gmra.mrb[2].mxu0 %vm196_vm1, %v6201_v23 }
 0x128   : > { %5107 = vmatprep.mubr.msk.f32.mxu1 %vm196_vm1, %v6459_v52  ;;  %5330 = vmatprep.mubr.msk.f32.mxu0 %vm196_vm1, %v6205_v25 }
 0x12b   : > { %5108 = vmatmul.mubr.msk.f32.gmra.mrb[22].mxu1 %vm196_vm1, %v6469_v54  ;;  %5331 = vmatmul.mubr.msk.f32.gmra.mrb[4].mxu0 %vm196_vm1, %v6217_v27 }
 0x12c   : > { %5110 = vmatprep.mubr.msk.f32.mxu1 %vm196_vm1, %v6471_v15  ;;  %5333 = vmatprep.mubr.msk.f32.mxu0 %vm196_vm1, %v6221_v29 }
 0x12f   : > { %5111 = vmatmul.mubr.msk.f32.gmra.mrb[24].mxu1 %vm196_vm1, %v6481_v59  ;;  %5334 = vmatmul.mubr.msk.f32.gmra.mrb[6].mxu0 %vm196_vm1, %v6233_v31 }
 0x130   : > { %5113 = vmatprep.mubr.msk.f32.mxu1 %vm196_vm1, %v6483_v56  ;;  %5336 = vmatprep.mubr.msk.f32.mxu0 %vm196_vm1, %v6237_v33 }
 0x133   : > { %5114 = vmatmul.mubr.msk.f32.gmra.mrb[26].mxu1 %vm196_vm1, %v6493_v36  ;;  %5337 = vmatmul.mubr.msk.f32.gmra.mrb[8].mxu0 %vm196_vm1, %v6249_v35 }
 0x134   : > { %5116 = vmatprep.mubr.msk.f32.mxu1 %vm196_vm1, %v6495_v42  ;;  %5339 = vmatprep.mubr.msk.f32.mxu0 %vm196_vm1, %v6253_v37 }
 0x137   : > { %5117 = vmatmul.mubr.msk.f32.gmra.mrb[28].mxu1 %vm196_vm1, %v6505_v28  ;;  %5340 = vmatmul.mubr.msk.f32.gmra.mrb[10].mxu0 %vm196_vm1, %v6265_v39  ;;  %v6859_v39 = vld [vmem:[%s7060_s2] ss:$0 sm:$0xff] }
 0x138   : > { %5119 = vmatprep.mubr.msk.f32.mxu1 %vm196_vm1, %v6565_v11  ;;  %5342 = vmatprep.mubr.msk.f32.mxu0 %vm196_vm1, %v6267_v41 }
 0x13b   : > { %5120 = vmatmul.mubr.msk.f32.gmra.mrb[30].mxu1 %vm196_vm1, %v6575_v13  ;;  %5343 = vmatmul.mubr.msk.f32.gmra.mrb[12].mxu0 %vm196_vm1, %v6276_v43 }
 0x13c   : > { %5148 = vmatprep.mubr.msk.f32.mxu1 %vm196_vm1, %v1879_v9  ;;  %5345 = vmatprep.mubr.msk.f32.mxu0 %vm196_vm1, %v6280_v45 }
 0x13f   : > { %5149 = vmatmul.mubr.msk.f32.vlgmr.msra.gmra.mrb[16].mxu1 %vm196_vm1, %v7146_v0  ;;  %5346 = vmatmul.mubr.msk.f32.gmra.mrb[14].mxu0 %vm196_vm1, %v6296_v48 }
 0x140   : > { %5151 = vmatprep.mubr.msk.f32.mxu1 %vm196_vm1, %v7148_v3  ;;  %5348 = vmatprep.mubr.msk.f32.mxu0 %vm196_vm1, %v6302_v50 }
 0x143   : > { %5152 = vmatmul.mubr.msk.f32.gmra.mrb[18].mxu1 %vm196_vm1, %v7150_v5  ;;  %5349 = vmatmul.mubr.msk.f32.gmra.mrb[16].mxu0 %vm196_vm1, %v6316_v51 }
 0x144   : > { %5154 = vmatprep.mubr.msk.f32.mxu1 %vm196_vm1, %v7152_v7  ;;  %5351 = vmatprep.mubr.msk.f32.mxu0 %vm196_vm1, %v6320_v53 }
 0x147   : > { %5155 = vmatmul.mubr.msk.f32.gmra.mrb[20].mxu1 %vm196_vm1, %v7154_v18  ;;  %5352 = vmatmul.mubr.msk.f32.gmra.mrb[18].mxu0 %vm196_vm1, %v6332_v55 }
 0x148   : > { %5157 = vmatprep.mubr.msk.f32.mxu1 %vm196_vm1, %v7156_v2  ;;  %5354 = vmatprep.mubr.msk.f32.mxu0 %vm196_vm1, %v6336_v57 }
 0x14b   : > { %5158 = vmatmul.mubr.msk.f32.gmra.mrb[22].mxu1 %vm196_vm1, %v7158_v32  ;;  %5355 = vmatmul.mubr.msk.f32.gmra.mrb[20].mxu0 %vm196_vm1, %v6348_v40 }
 0x14c   : > { %5160 = vmatprep.mubr.msk.f32.mxu1 %vm196_vm1, %v7160_v61  ;;  %5357 = vmatprep.mubr.msk.f32.mxu0 %vm196_vm1, %v6352_v38 }
 0x14f   : > { %5161 = vmatmul.mubr.msk.f32.gmra.mrb[24].mxu1 %vm196_vm1, %v7162_v63  ;;  %5358 = vmatmul.mubr.msk.f32.gmra.mrb[22].mxu0 %vm196_vm1, %v6364_v34 }
 0x150   : > { %5163 = vmatprep.mubr.msk.f32.mxu1 %vm196_vm1, %v7164_v4  ;;  %5360 = vmatprep.mubr.msk.f32.mxu0 %vm196_vm1, %v6368_v30 }
 0x153   : > { %5164 = vmatmul.mubr.msk.f32.gmra.mrb[26].mxu1 %vm196_vm1, %v7166_v8  ;;  %5361 = vmatmul.mubr.msk.f32.gmra.mrb[24].mxu0 %vm196_vm1, %v6380_v26 }
 0x154   : > { %5166 = vmatprep.mubr.msk.f32.mxu1 %vm196_vm1, %v7167_v46  ;;  %5363 = vmatprep.mubr.msk.f32.mxu0 %vm196_vm1, %v6384_v22 }
 0x157   : > { %5167 = vmatmul.mubr.msk.f32.gmra.mrb[28].mxu1 %vm196_vm1, %v7169_v62  ;;  %5364 = vmatmul.mubr.msk.f32.gmra.mrb[26].mxu0 %vm196_vm1, %v7141_v58 }
 0x158   : > { %5169 = vmatprep.mubr.msk.f32.mxu1 %vm196_vm1, %v6699_v20  ;;  %5366 = vmatprep.mubr.msk.f32.mxu0 %vm196_vm1, %v7170_v10 }
 0x15b   : > { %5170 = vmatmul.mubr.msk.f32.gmra.mrb[30].mxu1 %vm196_vm1, %v6709_v1  ;;  %5367 = vmatmul.mubr.msk.f32.gmra.mrb[28].mxu0 %vm196_vm1, %v7171_v14 }
 0x15c   : > { %5369 = vmatprep.mubr.msk.f32.mxu0 %vm196_vm1, %v3454_v12 }
 0x15f   : > { %5370 = vmatmul.mubr.msk.f32.gmra.mrb[30].mxu0 %vm196_vm1, %v3455_v16 }
 0x1d2   : > { %v5076_v19 = vpop.f32.mrb[0].mxu1 }
 0x1d3   : > { %v1672_v21 = vpop.f32.mrb[1].mxu1 }
 0x1d6   : > { %v5079_v22 = vpop.f32.mrb[2].mxu1 }
 0x1d7   : > { %v1682_v23 = vpop.f32.mrb[3].mxu1 }
 0x1da   : > { %v5082_v25 = vpop.f32.mrb[4].mxu1 }
 0x1db   : > { %v1692_v26 = vpop.f32.mrb[5].mxu1 }
 0x1de   : > { %v5085_v27 = vpop.f32.mrb[6].mxu1 }
 0x1df   : > { %v1702_v28 = vpop.f32.mrb[7].mxu1 }
 0x1e2   : > { %v5088_v29 = vpop.f32.mrb[8].mxu1 }
 0x1e3   : > { %v6842_v30 = vpop.f32.mrb[9].mxu1 }
 0x1e6   : > { %v6844_v31 = vpop.f32.mrb[10].mxu1 }
 0x1e7   : > { %v6846_v33 = vpop.f32.mrb[11].mxu1 }
 0x1ea   : > { %v6848_v34 = vpop.f32.mrb[12].mxu1 }
 0x1eb   : > { %v6850_v35 = vpop.f32.mrb[13].mxu1 }
 0x1ee   : > { %v6852_v36 = vpop.f32.mrb[14].mxu1 }
 0x1ef   : > { %v6854_v37 = vpop.f32.mrb[15].mxu1 }
 0x1f6   : > { %v5326_v38 = vpop.f32.mrb[0].mxu0 }
 0x1f7   : > { %v5374_v41 = vadd.f32 %v5326_v38, %v5076_v19  ;;  %v3623_v43 = vpop.f32.mrb[1].mxu0 }
 0x1f8   : > { %v5375_v45 = vadd.f32 %v3623_v43, %v1672_v21 }
 0x1f9   : > { %v3822_v47 = vmul.f32 %v5374_v41, %v6859_v39 }
 0x1fa   : > { %v3821_v48 = vmul.f32 %v5375_v45, %v6859_v39  ;;  %v5329_v49 = vpop.f32.mrb[2].mxu0 }
 0x1fb   : > { %v3861_v50 = vadd.f32 %v6865_v44, %v3822_v47  ;;  %v5376_v15 = vadd.f32 %v5329_v49, %v5079_v22  ;;  %v3633_v51 = vpop.f32.mrb[3].mxu0 }
 0x1fc   : > { %v3860_v52 = vadd.f32 %v6865_v44, %v3821_v48  ;;  %v5377_v53 = vadd.f32 %v3633_v51, %v1682_v23 }
 0x1fd   : > { %v3893_v54 = vmax.f32 %v3861_v50, 0.0  ;;  %v3824_v55 = vmul.f32 %v5376_v15, %v6859_v39 }
 0x1fe   : > { %v3892_v56 = vmax.f32 %v3860_v52, 0.0  ;;  %v3823_v57 = vmul.f32 %v5377_v53, %v6859_v39  ;;  %v5332_v59 = vpop.f32.mrb[4].mxu0 }
 0x1ff   : > { %v4514_v40 = vpack.c.bf16 %v3893_v54, %v3893_v54  ;;  %v3863_v42 = vadd.f32 %v6865_v44, %v3824_v55  ;;  %v5378_v17 = vadd.f32 %v5332_v59, %v5082_v25  ;;  %v3643_v11 = vpop.f32.mrb[5].mxu0 }
 0x200   : > { %v4513_v13 = vpack.c.bf16 %v3892_v56, %v3892_v56  ;;  %v3862_v58 = vadd.f32 %v6865_v44, %v3823_v57  ;;  %v5379_v0 = vadd.f32 %v3643_v11, %v1692_v26 }
 0x201   : > { %4054 = vst.msk [vmem:[%s6877_s13 + $0x4] sm:$0xf] %vm4052_vm3, %v4514_v40  ;;  %v3895_v3 = vmax.f32 %v3863_v42, 0.0  ;;  %v3826_v5 = vmul.f32 %v5378_v17, %v6859_v39 }
 0x202   : > { %4053 = vst.msk [vmem:[%s6877_s13] sm:$0xf] %vm4052_vm3, %v4513_v13  ;;  %v3894_v7 = vmax.f32 %v3862_v58, 0.0  ;;  %v3825_v18 = vmul.f32 %v5379_v0, %v6859_v39  ;;  %v5335_v2 = vpop.f32.mrb[6].mxu0 }
 0x203   : > { %v4516_v32 = vpack.c.bf16 %v3895_v3, %v3895_v3  ;;  %v3865_v61 = vadd.f32 %v6865_v44, %v3826_v5  ;;  %v5380_v63 = vadd.f32 %v5335_v2, %v5085_v27  ;;  %v3653_v4 = vpop.f32.mrb[7].mxu0 }
 0x204   : > { %v4515_v8 = vpack.c.bf16 %v3894_v7, %v3894_v7  ;;  %v3864_v46 = vadd.f32 %v6865_v44, %v3825_v18  ;;  %v5381_v20 = vadd.f32 %v3653_v4, %v1702_v28 }
 0x205   : > { %4056 = vst.msk [vmem:[%s6877_s13 + $0xc] sm:$0xf] %vm4052_vm3, %v4516_v32  ;;  %v3897_v60 = vmax.f32 %v3865_v61, 0.0  ;;  %v3828_v62 = vmul.f32 %v5380_v63, %v6859_v39 }
 0x206   : > { %4055 = vst.msk [vmem:[%s6877_s13 + $0x8] sm:$0xf] %vm4052_vm3, %v4515_v8  ;;  %v3896_v1 = vmax.f32 %v3864_v46, 0.0  ;;  %v3827_v24 = vmul.f32 %v5381_v20, %v6859_v39  ;;  %v5338_v6 = vpop.f32.mrb[8].mxu0 }
 0x207   : > { %v4518_v9 = vpack.c.bf16 %v3897_v60, %v3897_v60  ;;  %v3867_v10 = vadd.f32 %v6865_v44, %v3828_v62  ;;  %v5382_v12 = vadd.f32 %v5338_v6, %v5088_v29  ;;  %v3663_v14 = vpop.f32.mrb[9].mxu0 }
 0x208   : > { %v4517_v16 = vpack.c.bf16 %v3896_v1, %v3896_v1  ;;  %v3866_v19 = vadd.f32 %v6865_v44, %v3827_v24  ;;  %v5383_v21 = vadd.f32 %v3663_v14, %v6842_v30 }
 0x209   : > { %4058 = vst.msk [vmem:[%s6877_s13 + $0x14] sm:$0xf] %vm4052_vm3, %v4518_v9  ;;  %v3899_v22 = vmax.f32 %v3867_v10, 0.0  ;;  %v3830_v23 = vmul.f32 %v5382_v12, %v6859_v39 }
 0x20a   : > { %4057 = vst.msk [vmem:[%s6877_s13 + $0x10] sm:$0xf] %vm4052_vm3, %v4517_v16  ;;  %v3898_v25 = vmax.f32 %v3866_v19, 0.0  ;;  %v3829_v26 = vmul.f32 %v5383_v21, %v6859_v39  ;;  %v5341_v27 = vpop.f32.mrb[10].mxu0 }
 0x20b   : > { %v4520_v28 = vpack.c.bf16 %v3899_v22, %v3899_v22  ;;  %v3869_v29 = vadd.f32 %v6865_v44, %v3830_v23  ;;  %v5384_v38 = vadd.f32 %v5341_v27, %v6844_v31  ;;  %v3673_v41 = vpop.f32.mrb[11].mxu0 }
 0x20c   : > { %v4519_v43 = vpack.c.bf16 %v3898_v25, %v3898_v25  ;;  %v3868_v30 = vadd.f32 %v6865_v44, %v3829_v26  ;;  %v5385_v45 = vadd.f32 %v3673_v41, %v6846_v33 }
 0x20d   : > { %4060 = vst.msk [vmem:[%s6877_s13 + $0x1c] sm:$0xf] %vm4052_vm3, %v4520_v28  ;;  %v3901_v47 = vmax.f32 %v3869_v29, 0.0  ;;  %v3832_v48 = vmul.f32 %v5384_v38, %v6859_v39 }
 0x20e   : > { %4059 = vst.msk [vmem:[%s6877_s13 + $0x18] sm:$0xf] %vm4052_vm3, %v4519_v43  ;;  %v3900_v49 = vmax.f32 %v3868_v30, 0.0  ;;  %v3831_v50 = vmul.f32 %v5385_v45, %v6859_v39  ;;  %v5344_v15 = vpop.f32.mrb[12].mxu0 }
 0x20f   : > { %v4522_v31 = vpack.c.bf16 %v3901_v47, %v3901_v47  ;;  %v3871_v51 = vadd.f32 %v6865_v44, %v3832_v48  ;;  %v5386_v52 = vadd.f32 %v5344_v15, %v6848_v34  ;;  %v3683_v53 = vpop.f32.mrb[13].mxu0 }
 0x210   : > { %v4521_v54 = vpack.c.bf16 %v3900_v49, %v3900_v49  ;;  %v3870_v33 = vadd.f32 %v6865_v44, %v3831_v50  ;;  %v5387_v55 = vadd.f32 %v3683_v53, %v6850_v35 }
 0x211   : > { %4062 = vst.msk [vmem:[%s6877_s13 + $0x24] sm:$0xf] %vm4052_vm3, %v4522_v31  ;;  %v3903_v56 = vmax.f32 %v3871_v51, 0.0  ;;  %v3834_v57 = vmul.f32 %v5386_v52, %v6859_v39 }
 0x212   : > { %4061 = vst.msk [vmem:[%s6877_s13 + $0x20] sm:$0xf] %vm4052_vm3, %v4521_v54  ;;  %v3902_v59 = vmax.f32 %v3870_v33, 0.0  ;;  %v3833_v40 = vmul.f32 %v5387_v55, %v6859_v39  ;;  %v5150_v42 = vpop.f32.mrb[16].mxu1  ;;  %v5347_v34 = vpop.f32.mrb[14].mxu0 }
 0x213   : > { %v4524_v17 = vpack.c.bf16 %v3903_v56, %v3903_v56  ;;  %v3873_v11 = vadd.f32 %v6865_v44, %v3834_v57  ;;  %v5388_v13 = vadd.f32 %v5347_v34, %v6852_v36  ;;  %v2142_v35 = vpop.f32.mrb[17].mxu1  ;;  %v3693_v58 = vpop.f32.mrb[15].mxu0 }
 0x214   : > { %v4523_v0 = vpack.c.bf16 %v3902_v59, %v3902_v59  ;;  %v3872_v3 = vadd.f32 %v6865_v44, %v3833_v40  ;;  %v5389_v5 = vadd.f32 %v3693_v58, %v6854_v37 }
 0x215   : > { %4064 = vst.msk [vmem:[%s6877_s13 + $0x2c] sm:$0xf] %vm4052_vm3, %v4524_v17  ;;  %v3905_v7 = vmax.f32 %v3873_v11, 0.0  ;;  %v3836_v18 = vmul.f32 %v5388_v13, %v6859_v39 }
 0x216   : > { %4063 = vst.msk [vmem:[%s6877_s13 + $0x28] sm:$0xf] %vm4052_vm3, %v4523_v0  ;;  %v3904_v2 = vmax.f32 %v3872_v3, 0.0  ;;  %v3835_v32 = vmul.f32 %v5389_v5, %v6859_v39  ;;  %v5153_v36 = vpop.f32.mrb[18].mxu1  ;;  %v5350_v61 = vpop.f32.mrb[16].mxu0 }
 0x217   : > { %v4526_v63 = vpack.c.bf16 %v3905_v7, %v3905_v7  ;;  %v3875_v4 = vadd.f32 %v6865_v44, %v3836_v18  ;;  %v5390_v8 = vadd.f32 %v5350_v61, %v5150_v42  ;;  %v2152_v46 = vpop.f32.mrb[19].mxu1  ;;  %v3703_v37 = vpop.f32.mrb[17].mxu0 }
 0x218   : > { %v4525_v20 = vpack.c.bf16 %v3904_v2, %v3904_v2  ;;  %v3874_v60 = vadd.f32 %v6865_v44, %v3835_v32  ;;  %v5391_v62 = vadd.f32 %v3703_v37, %v2142_v35 }
 0x219   : > { %4066 = vst.msk [vmem:[%s6877_s13 + $0x34] sm:$0xf] %vm4052_vm3, %v4526_v63  ;;  %v3907_v1 = vmax.f32 %v3875_v4, 0.0  ;;  %v3838_v24 = vmul.f32 %v5390_v8, %v6859_v39 }
 0x21a   : > { %4065 = vst.msk [vmem:[%s6877_s13 + $0x30] sm:$0xf] %vm4052_vm3, %v4525_v20  ;;  %v3906_v6 = vmax.f32 %v3874_v60, 0.0  ;;  %v3837_v9 = vmul.f32 %v5391_v62, %v6859_v39  ;;  %v5156_v10 = vpop.f32.mrb[20].mxu1  ;;  %v5353_v12 = vpop.f32.mrb[18].mxu0 }
 0x21b   : > { %v4528_v14 = vpack.c.bf16 %v3907_v1, %v3907_v1  ;;  %v3877_v16 = vadd.f32 %v6865_v44, %v3838_v24  ;;  %v5392_v19 = vadd.f32 %v5353_v12, %v5153_v36  ;;  %v2162_v21 = vpop.f32.mrb[21].mxu1  ;;  %v3713_v22 = vpop.f32.mrb[19].mxu0 }
 0x21c   : > { %v4527_v23 = vpack.c.bf16 %v3906_v6, %v3906_v6  ;;  %v3876_v25 = vadd.f32 %v6865_v44, %v3837_v9  ;;  %v5393_v26 = vadd.f32 %v3713_v22, %v2152_v46 }
 0x21d   : > { %4068 = vst.msk [vmem:[%s6877_s13 + $0x3c] sm:$0xf] %vm4052_vm3, %v4528_v14  ;;  %v3909_v27 = vmax.f32 %v3877_v16, 0.0  ;;  %v3840_v28 = vmul.f32 %v5392_v19, %v6859_v39 }
 0x21e   : > { %4067 = vst.msk [vmem:[%s6877_s13 + $0x38] sm:$0xf] %vm4052_vm3, %v4527_v23  ;;  %v3908_v29 = vmax.f32 %v3876_v25, 0.0  ;;  %v3839_v38 = vmul.f32 %v5393_v26, %v6859_v39  ;;  %v5159_v41 = vpop.f32.mrb[22].mxu1  ;;  %v5356_v43 = vpop.f32.mrb[20].mxu0 }
 0x21f   : > { %v4530_v30 = vpack.c.bf16 %v3909_v27, %v3909_v27  ;;  %v3879_v45 = vadd.f32 %v6865_v44, %v3840_v28  ;;  %v5394_v47 = vadd.f32 %v5356_v43, %v5156_v10  ;;  %v2172_v48 = vpop.f32.mrb[23].mxu1  ;;  %v3723_v49 = vpop.f32.mrb[21].mxu0 }
 0x220   : > { %v4529_v50 = vpack.c.bf16 %v3908_v29, %v3908_v29  ;;  %v3878_v15 = vadd.f32 %v6865_v44, %v3839_v38  ;;  %v5395_v31 = vadd.f32 %v3723_v49, %v2162_v21 }
 0x221   : > { %4070 = vst.msk [vmem:[%s6877_s13 + $0x44] sm:$0xf] %vm4052_vm3, %v4530_v30  ;;  %v3911_v51 = vmax.f32 %v3879_v45, 0.0  ;;  %v3842_v52 = vmul.f32 %v5394_v47, %v6859_v39 }
 0x222   : > { %4069 = vst.msk [vmem:[%s6877_s13 + $0x40] sm:$0xf] %vm4052_vm3, %v4529_v50  ;;  %v3910_v53 = vmax.f32 %v3878_v15, 0.0  ;;  %v3841_v54 = vmul.f32 %v5395_v31, %v6859_v39  ;;  %v5162_v33 = vpop.f32.mrb[24].mxu1  ;;  %v5359_v55 = vpop.f32.mrb[22].mxu0 }
 0x223   : > { %v4532_v56 = vpack.c.bf16 %v3911_v51, %v3911_v51  ;;  %v3881_v57 = vadd.f32 %v6865_v44, %v3842_v52  ;;  %v5396_v59 = vadd.f32 %v5359_v55, %v5159_v41  ;;  %v2182_v40 = vpop.f32.mrb[25].mxu1  ;;  %v3733_v42 = vpop.f32.mrb[23].mxu0 }
 0x224   : > { %v4531_v34 = vpack.c.bf16 %v3910_v53, %v3910_v53  ;;  %v3880_v17 = vadd.f32 %v6865_v44, %v3841_v54  ;;  %v5397_v11 = vadd.f32 %v3733_v42, %v2172_v48 }
 0x225   : > { %4072 = vst.msk [vmem:[%s6877_s13 + $0x4c] sm:$0xf] %vm4052_vm3, %v4532_v56  ;;  %v3913_v13 = vmax.f32 %v3881_v57, 0.0  ;;  %v3844_v35 = vmul.f32 %v5396_v59, %v6859_v39 }
 0x226   : > { %4071 = vst.msk [vmem:[%s6877_s13 + $0x48] sm:$0xf] %vm4052_vm3, %v4531_v34  ;;  %v3912_v58 = vmax.f32 %v3880_v17, 0.0  ;;  %v3843_v0 = vmul.f32 %v5397_v11, %v6859_v39  ;;  %v5165_v3 = vpop.f32.mrb[26].mxu1  ;;  %v5362_v5 = vpop.f32.mrb[24].mxu0 }
 0x227   : > { %v4534_v7 = vpack.c.bf16 %v3913_v13, %v3913_v13  ;;  %v3883_v18 = vadd.f32 %v6865_v44, %v3844_v35  ;;  %v5398_v2 = vadd.f32 %v5362_v5, %v5162_v33  ;;  %v2192_v32 = vpop.f32.mrb[27].mxu1  ;;  %v3743_v36 = vpop.f32.mrb[25].mxu0 }
 0x228   : > { %v4533_v61 = vpack.c.bf16 %v3912_v58, %v3912_v58  ;;  %v3882_v63 = vadd.f32 %v6865_v44, %v3843_v0  ;;  %v5399_v4 = vadd.f32 %v3743_v36, %v2182_v40 }
 0x229   : > { %4074 = vst.msk [vmem:[%s6877_s13 + $0x54] sm:$0xf] %vm4052_vm3, %v4534_v7  ;;  %v3915_v8 = vmax.f32 %v3883_v18, 0.0  ;;  %v3846_v46 = vmul.f32 %v5398_v2, %v6859_v39 }
 0x22a   : > { %4073 = vst.msk [vmem:[%s6877_s13 + $0x50] sm:$0xf] %vm4052_vm3, %v4533_v61  ;;  %v3914_v37 = vmax.f32 %v3882_v63, 0.0  ;;  %v3845_v20 = vmul.f32 %v5399_v4, %v6859_v39  ;;  %v5168_v60 = vpop.f32.mrb[28].mxu1  ;;  %v5365_v62 = vpop.f32.mrb[26].mxu0 }
 0x22b   : > { %v4536_v1 = vpack.c.bf16 %v3915_v8, %v3915_v8  ;;  %v3885_v24 = vadd.f32 %v6865_v44, %v3846_v46  ;;  %v5400_v6 = vadd.f32 %v5365_v62, %v5165_v3  ;;  %v2202_v9 = vpop.f32.mrb[29].mxu1  ;;  %v3753_v10 = vpop.f32.mrb[27].mxu0 }
 0x22c   : > { %v4535_v12 = vpack.c.bf16 %v3914_v37, %v3914_v37  ;;  %v3884_v14 = vadd.f32 %v6865_v44, %v3845_v20  ;;  %v5401_v16 = vadd.f32 %v3753_v10, %v2192_v32 }
 0x22d   : > { %4076 = vst.msk [vmem:[%s6877_s13 + $0x5c] sm:$0xf] %vm4052_vm3, %v4536_v1  ;;  %v3917_v19 = vmax.f32 %v3885_v24, 0.0  ;;  %v3848_v21 = vmul.f32 %v5400_v6, %v6859_v39 }
 0x22e   : > { %4075 = vst.msk [vmem:[%s6877_s13 + $0x58] sm:$0xf] %vm4052_vm3, %v4535_v12  ;;  %v3916_v22 = vmax.f32 %v3884_v14, 0.0  ;;  %v3847_v23 = vmul.f32 %v5401_v16, %v6859_v39  ;;  %v5171_v25 = vpop.f32.mrb[30].mxu1  ;;  %v5368_v26 = vpop.f32.mrb[28].mxu0 }
 0x22f   : > { %v4538_v27 = vpack.c.bf16 %v3917_v19, %v3917_v19  ;;  %v3887_v28 = vadd.f32 %v6865_v44, %v3848_v21  ;;  %v5402_v29 = vadd.f32 %v5368_v26, %v5168_v60  ;;  %v2212_v38 = vpop.f32.mrb[31].mxu1  ;;  %v3763_v41 = vpop.f32.mrb[29].mxu0 }
 0x230   : > { %v4537_v43 = vpack.c.bf16 %v3916_v22, %v3916_v22  ;;  %v3886_v30 = vadd.f32 %v6865_v44, %v3847_v23  ;;  %v5403_v45 = vadd.f32 %v3763_v41, %v2202_v9 }
 0x231   : > { %4078 = vst.msk [vmem:[%s6877_s13 + $0x64] sm:$0xf] %vm4052_vm3, %v4538_v27  ;;  %v3919_v47 = vmax.f32 %v3887_v28, 0.0  ;;  %v3850_v48 = vmul.f32 %v5402_v29, %v6859_v39 }
 0x232   : > { %4077 = vst.msk [vmem:[%s6877_s13 + $0x60] sm:$0xf] %vm4052_vm3, %v4537_v43  ;;  %v3918_v49 = vmax.f32 %v3886_v30, 0.0  ;;  %v3849_v50 = vmul.f32 %v5403_v45, %v6859_v39  ;;  %v5371_v15 = vpop.f32.mrb[30].mxu0 }
 0x233   : > { %v4540_v31 = vpack.c.bf16 %v3919_v47, %v3919_v47  ;;  %v3889_v51 = vadd.f32 %v6865_v44, %v3850_v48  ;;  %v5404_v52 = vadd.f32 %v5371_v15, %v5171_v25  ;;  %v3773_v53 = vpop.f32.mrb[31].mxu0 }
 0x234   : > { %v4539_v54 = vpack.c.bf16 %v3918_v49, %v3918_v49  ;;  %v3888_v33 = vadd.f32 %v6865_v44, %v3849_v50  ;;  %v5405_v55 = vadd.f32 %v3773_v53, %v2212_v38 }
 0x235   : > { %4080 = vst.msk [vmem:[%s6877_s13 + $0x6c] sm:$0xf] %vm4052_vm3, %v4540_v31  ;;  %v3921_v56 = vmax.f32 %v3889_v51, 0.0  ;;  %v3852_v57 = vmul.f32 %v5404_v52, %v6859_v39 }
 0x236   : > { %4079 = vst.msk [vmem:[%s6877_s13 + $0x68] sm:$0xf] %vm4052_vm3, %v4539_v54  ;;  %v3920_v59 = vmax.f32 %v3888_v33, 0.0  ;;  %v3851_v40 = vmul.f32 %v5405_v55, %v6859_v39 }
 0x237   : > { %v4542_v42 = vpack.c.bf16 %v3921_v56, %v3921_v56  ;;  %v3891_v34 = vadd.f32 %v6865_v44, %v3852_v57 }
 0x238   : > { %v4541_v17 = vpack.c.bf16 %v3920_v59, %v3920_v59  ;;  %v3890_v11 = vadd.f32 %v6865_v44, %v3851_v40 }
 0x239   : > { %4082 = vst.msk [vmem:[%s6877_s13 + $0x74] sm:$0xf] %vm4052_vm3, %v4542_v42  ;;  %v3923_v13 = vmax.f32 %v3891_v34, 0.0 }
 0x23a   : > { %4081 = vst.msk [vmem:[%s6877_s13 + $0x70] sm:$0xf] %vm4052_vm3, %v4541_v17  ;;  %v3922_v35 = vmax.f32 %v3890_v11, 0.0 }
 0x23b   : > { %v4544_v58 = vpack.c.bf16 %v3923_v13, %v3923_v13 }
 0x23c   : > { %v4543_v39 = vpack.c.bf16 %v3922_v35, %v3922_v35 }
 0x23d   : > { %4084 = vst.msk [vmem:[%s6877_s13 + $0x7c] sm:$0xf] %vm4052_vm3, %v4544_v58 }
 0x23e   : > { %4083 = vst.msk [vmem:[%s6877_s13 + $0x78] sm:$0xf] %vm4052_vm3, %v4543_v39 }
 0x23f   : > { %5685 = shalt.err (!%p5682_p3)
}
 0x240   : > { %s5686_s6 = scalar_lea.hbm %s7007_s27, 2048  ;;  %s5690_s9 = scalar_lea.hbm %s7062_s4, 4096 }
 0x241   : > { %p5687_p4 = scmp.ne.s32.totalorder %s7007_s27, %s5686_s6  ;;  %p5691_p9 = scmp.lt.u32.totalorder %s7007_s27, %s7062_s4 }
 0x242   : > { %p5692_p10 = scmp.lt.u32.totalorder %s5690_s9, %s5686_s6  ;;  %p5694_p12 = scmp.lt.u32.totalorder %s5686_s6, %s7007_s27 }
 0x243   : > { %p5688_p7 = pnand %p5687_p4, %p5803_p5 }
 0x244   : > { %p5693_p11 = por %p5692_p10, %p5691_p9 }
 0x245   : > { %p5689_p8 = pneg %p5688_p7 }
 0x246   : > { %p5695_p13 = por %p5694_p12, %p5693_p11 }
 0x248   : > { %p5696_p0 = pnand %p5695_p13, %p5689_p8 }
 0x24a   : > { %5699 = shalt.err (!%p5696_p0)
}
 0x24b   : > { %s5738_s12 = smov 64   ;;  %s5739_s13 = smov 4  }
 0x24c   : > { %5630 = dma.vmem_to_hbm [thread:$0]  (%p5803_p5), %s7009_s20, 2048, %s7007_s27, %s7017_s19, %s5738_s12, %s5738_s12, %s5739_s13  }
 0x24d PF: > { %p5636_p1 = scmp.ge.s32.totalorder %s5734_s18, 2  ;;  %s4114_s14 = sand.u32 1, %s5722_s15  }
 0x24e   : > { %s4115_s22 = scalar_lea.sflag [#allocation4], %s4114_s14 }
 0x24f   : > { %p5633_p2 = pnand %p5636_p1, %p5807_p6 }
 0x251   : > { %5717 = dma.done.wait (!%p5633_p2), %s4115_s22, 2048  }
 0x252   : > { %5719 = vsyncadd (!%p5633_p2), %s4115_s22, 4294965248  ;;  %p14_p3 = scmp.ge.s32.totalorder %s5790_s21, 4   ;;  %s7172_s15 = smov %s5726_s16 }
 0x253   : > { %s7173_s16 = smov %s5730_s17  ;;  %s7174_s17 = smov %s5801_s24 }
 0x254   : > { %s7175_s18 = smov %s5790_s21  ;;  %16 = sbr.rel (!%p14_p3) target bundleno = 3 (0x3), region = 81 }
 0x25b   :  { %4120 = vsyncpa [#allocation4], 1 }
 0x25c   :  { %4122 = vsyncpa [#allocation4 + $0x1], 1 }

</bundles_post_ra>
